<compile_context>
chip_gen: v7x
topology: tpu7x:2x2x1
jax: 0.10.0
libtpu: 0.0.40
codegen_flags: <defaults>
</compile_context>

<pallas_src>
import functools

import jax
import jax.numpy as jnp
import numpy as np
from jax.experimental import pallas as pl
from jax.experimental.pallas import tpu as pltpu

HIDDEN = 64
LAYERS = 2
IN_FEATURES = 36
OUT_FEATURES = 4
BATCH_PAD = 8          # one sublane tile
OUT_PAD = 128          # one lane tile for the output store


def _lstm_model_kernel(x_ref, h0_ref, c0_ref,
                       w1t_ref, b1_ref,
                       wih0t_ref, bl0_ref,
                       wblk_ref, bl1_ref,
                       w2t_ref, b2_ref,
                       out_ref, hlast_ref,
                       *, last_row: int, seq_len: int):
    """Batched non-recurrent matmuls + layer-pipelined unrolled recurrence."""
    H = HIDDEN
    G = 4 * H
    BP = h0_ref.shape[1]          # padded batch (8), static
    T = seq_len                   # static (8)

    # ---- loop-invariant loads / broadcasts hoisted out of the time loop ----
    wblk = wblk_ref[...]                                     # (128, 512) block RHS
    bl1b = jnp.broadcast_to(bl1_ref[...], (BP, G))           # (8, 256)

    # ---- non-recurrent work batched across all timesteps ----
    # fc1 + relu: (T*8, 36) @ (36, 64)
    a_all = jnp.maximum(
        jnp.dot(x_ref[...], w1t_ref[...], preferred_element_type=jnp.float32)
        + b1_ref[...], 0.0)                                   # (T*8, 64)
    # layer-0 input projection for all timesteps: (T*8, 64) @ (64, 256)
    z0_all = jnp.dot(a_all, wih0t_ref[...],
                     preferred_element_type=jnp.float32) + bl0_ref[...]   # (T*8, 256)

    # initial hidden / cell state (padded rows are zeros; batch rows are independent)
    h0 = h0_ref[0]
    c0 = c0_ref[0]
    h1 = h0_ref[1]
    c1 = c0_ref[1]

    def combine(gates, c_prev):
        # one full-width sigmoid over all 4 gates (EUP slot), tanh only on g
        sg = jax.nn.sigmoid(gates)                 # (8, 256)
        i = sg[:, 0:H]
        f = sg[:, H:2 * H]
        o = sg[:, 3 * H:4 * H]
        g = jnp.tanh(gates[:, 2 * H:3 * H])
        c_new = f * c_prev + i * g
        h_new = o * jnp.tanh(c_new)
        return h_new, c_new

    # Software-pipelined, fully-unrolled recurrence: 9 dependent matmuls total.
    #   super-step s: LHS = [h0(s-1) | h1(s-2)]  (8, 128)
    #     left  half of result + z0_all[s] -> gates0(s)     (skipped at s == T)
    #     right half of result + bl1       -> gates1(s-1)   (skipped at s == 0)
    for s in range(T + 1):
        lhs = jnp.concatenate([h0, h1], axis=1)               # (8, 128)
        res = jnp.dot(lhs, wblk, preferred_element_type=jnp.float32)   # (8, 512)
        if s < T:
            g0 = res[:, 0:G] + z0_all[s * BP:(s + 1) * BP, :]
            h0n, c0n = combine(g0, c0)                        # h0(s), c0(s)
        if s > 0:
            g1 = res[:, G:2 * G] + bl1b
            h1, c1 = combine(g1, c1)                          # h1(s-1), c1(s-1)
            # torch's x[:, -1, :]: keep the last ORIGINAL batch row for step s-1
            hlast_ref[s - 1:s, :] = h1[last_row:last_row + 1, :]
        if s < T:
            h0, c0 = h0n, c0n

    # ---- fc2 + sigmoid epilogue: (T, 64) @ (64, 128), one unmasked full store ----
    y = jax.nn.sigmoid(
        jnp.dot(hlast_ref[...], w2t_ref[...], preferred_element_type=jnp.float32)
        + b2_ref[...])
    out_ref[...] = y.astype(out_ref.dtype)


def lstm_model_forward(x, h0, c0, params):
    (w1, b1, wih0, whh0, bih0, bhh0,
     wih1, whh1, bih1, bhh1, w2, b2) = params
    T, B, _ = x.shape
    assert B <= BATCH_PAD
    H = HIDDEN
    G = 4 * H

    # ---- weight prep: transpose / fuse into the (128, 512) block RHS ----
    w1t = w1.T                                                  # (36, 64)
    wih0t = wih0.T                                              # (64, 256)
    wblk = jnp.concatenate(
        [jnp.concatenate([whh0.T, jnp.zeros((H, G), jnp.float32)], axis=0),
         jnp.concatenate([wih1.T, whh1.T], axis=0)],
        axis=1)                                                 # (128, 512)
    w2t = jnp.zeros((H, OUT_PAD), jnp.float32).at[:, :OUT_FEATURES].set(w2.T)
    b1r = b1.reshape(1, -1)                                     # (1, 64)
    bl0 = (bih0 + bhh0).reshape(1, -1)                          # (1, 256)
    bl1 = (bih1 + bhh1).reshape(1, -1)                          # (1, 256)
    b2r = jnp.zeros((1, OUT_PAD), jnp.float32).at[:, :OUT_FEATURES].set(
        b2.reshape(1, -1))                                      # (1, 128)

    # ---- pad batch to one sublane tile so per-step operands are (8, .)-aligned ----
    xp = jnp.pad(x, ((0, 0), (0, BATCH_PAD - B), (0, 0)))
    x2 = xp.reshape(T * BATCH_PAD, IN_FEATURES)                 # (T*8, 36)
    h0p = jnp.pad(h0, ((0, 0), (0, BATCH_PAD - B), (0, 0)))     # (2, 8, 64)
    c0p = jnp.pad(c0, ((0, 0), (0, BATCH_PAD - B), (0, 0)))     # (2, 8, 64)

    inputs = [x2, h0p, c0p, w1t, b1r, wih0t, bl0, wblk, bl1, w2t, b2r]
    vmem_specs = [pl.BlockSpec(memory_space=pltpu.MemorySpace.VMEM)
                  for _ in inputs]

    kernel = functools.partial(_lstm_model_kernel, last_row=B - 1, seq_len=T)
    out = pl.pallas_call(
        kernel,
        out_shape=jax.ShapeDtypeStruct((T, OUT_PAD), jnp.float32),
        in_specs=vmem_specs,
        out_specs=pl.BlockSpec(memory_space=pltpu.MemorySpace.VMEM),
        scratch_shapes=[pltpu.VMEM((T, HIDDEN), jnp.float32)],
    )(*inputs)
    return out[:, :OUT_FEATURES]


def reference_forward(x, h0, c0, params):
    """Pure-JAX reference mirroring the PyTorch forward."""
    (w1, b1, wih0, whh0, bih0, bhh0,
     wih1, whh1, bih1, bhh1, w2, b2) = params
    H = HIDDEN
    a = jax.nn.relu(jnp.einsum('tbi,hi->tbh', x, w1) + b1)

    def run_layer(seq, h, c, wih, whh, bih, bhh):
        outs = []
        for t in range(seq.shape[0]):
            gates = seq[t] @ wih.T + h @ whh.T + bih + bhh
            i = jax.nn.sigmoid(gates[:, :H])
            f = jax.nn.sigmoid(gates[:, H:2 * H])
            g = jnp.tanh(gates[:, 2 * H:3 * H])
            o = jax.nn.sigmoid(gates[:, 3 * H:])
            c = f * c + i * g
            h = o * jnp.tanh(c)
            outs.append(h)
        return jnp.stack(outs)

    s1 = run_layer(a, h0[0], c0[0], wih0, whh0, bih0, bhh0)
    s2 = run_layer(s1, h0[1], c0[1], wih1, whh1, bih1, bhh1)
    last = s2[:, -1, :]
    return jax.nn.sigmoid(last @ w2.T + b2)


def init_params(key):
    ks = jax.random.split(key, 12)
    H, I, O = HIDDEN, IN_FEATURES, OUT_FEATURES
    u = lambda k, shape, bound: jax.random.uniform(
        k, shape, jnp.float32, minval=-bound, maxval=bound)
    w1 = u(ks[0], (H, I), 1.0 / np.sqrt(I))
    b1 = u(ks[1], (H,), 1.0 / np.sqrt(I))
    wih0 = u(ks[2], (4 * H, H), 1.0 / np.sqrt(H))
    whh0 = u(ks[3], (4 * H, H), 1.0 / np.sqrt(H))
    bih0 = u(ks[4], (4 * H,), 1.0 / np.sqrt(H))
    bhh0 = u(ks[5], (4 * H,), 1.0 / np.sqrt(H))
    wih1 = u(ks[6], (4 * H, H), 1.0 / np.sqrt(H))
    whh1 = u(ks[7], (4 * H, H), 1.0 / np.sqrt(H))
    bih1 = u(ks[8], (4 * H,), 1.0 / np.sqrt(H))
    bhh1 = u(ks[9], (4 * H,), 1.0 / np.sqrt(H))
    w2 = u(ks[10], (O, H), 1.0 / np.sqrt(H))
    b2 = u(ks[11], (O,), 1.0 / np.sqrt(H))
    return (w1, b1, wih0, whh0, bih0, bhh0, wih1, whh1, bih1, bhh1, w2, b2)


if __name__ == "__main__":
    key = jax.random.PRNGKey(0)
    k_x, k_h, k_c, k_p = jax.random.split(key, 4)

    T, B = 8, 2
    x = jax.random.normal(k_x, (T, B, IN_FEATURES), jnp.float32)
    # torch's init_hidden uses randn inside forward; deterministic equivalent
    # passed explicitly as inputs here.
    h0 = jax.random.normal(k_h, (LAYERS, B, HIDDEN), jnp.float32)
    c0 = jax.random.normal(k_c, (LAYERS, B, HIDDEN), jnp.float32)
    params = init_params(k_p)

    out = lstm_model_forward(x, h0, c0, params)
    out = jax.block_until_ready(out)

    ref = reference_forward(x, h0, c0, params)
    np.testing.assert_allclose(np.asarray(out), np.asarray(ref), rtol=1e-4, atol=1e-4)
    assert out.shape == (T, OUT_FEATURES)
    print("KERNEL_OK")
</pallas_src>

<mosaic_0001>
module attributes {stable_mosaic.version = 11 : i64} {
  func.func @_lstm_model_kernel(%arg0: memref<64x36xf32, #tpu.memory_space<vmem>>, %arg1: memref<2x8x64xf32, #tpu.memory_space<vmem>>, %arg2: memref<2x8x64xf32, #tpu.memory_space<vmem>>, %arg3: memref<36x64xf32, #tpu.memory_space<vmem>>, %arg4: memref<1x64xf32, #tpu.memory_space<vmem>>, %arg5: memref<64x256xf32, #tpu.memory_space<vmem>>, %arg6: memref<1x256xf32, #tpu.memory_space<vmem>>, %arg7: memref<128x512xf32, #tpu.memory_space<vmem>>, %arg8: memref<1x256xf32, #tpu.memory_space<vmem>>, %arg9: memref<64x128xf32, #tpu.memory_space<vmem>>, %arg10: memref<1x128xf32, #tpu.memory_space<vmem>>, %arg11: memref<8x128xf32, #tpu.memory_space<vmem>>, %arg12: memref<8x64xf32, #tpu.memory_space<vmem>>) attributes {dimension_semantics = [], scalar_prefetch = 0 : i64, scratch_operands = 1 : i64, tpu.core_type = #tpu.core_type<tc>} {
    %c0 = arith.constant 0 : index
    %c0_0 = arith.constant 0 : index
    %0 = vector.load %arg7[%c0, %c0_0] : memref<128x512xf32, #tpu.memory_space<vmem>>, vector<128x512xf32>
    %c0_1 = arith.constant 0 : index
    %c0_2 = arith.constant 0 : index
    %1 = vector.load %arg8[%c0_1, %c0_2] : memref<1x256xf32, #tpu.memory_space<vmem>>, vector<1x256xf32>
    %2 = vector.shape_cast %1 : vector<1x256xf32> to vector<1x256xf32>
    %3 = vector.broadcast %2 : vector<1x256xf32> to vector<8x256xf32>
    %c0_3 = arith.constant 0 : index
    %c0_4 = arith.constant 0 : index
    %4 = vector.load %arg0[%c0_3, %c0_4] : memref<64x36xf32, #tpu.memory_space<vmem>>, vector<64x36xf32>
    %c0_5 = arith.constant 0 : index
    %c0_6 = arith.constant 0 : index
    %5 = vector.load %arg3[%c0_5, %c0_6] : memref<36x64xf32, #tpu.memory_space<vmem>>, vector<36x64xf32>
    %cst = arith.constant dense<0.000000e+00> : vector<64x64xf32>
    %6 = tpu.matmul %4, %5, %cst {dimension_numbers = #tpu.dot_dimension_numbers<[1], [0], [0], [1], [0, 0, 1, 1], [], []>} : vector<64x36xf32>, vector<36x64xf32>, vector<64x64xf32> -> vector<64x64xf32>
    %c0_7 = arith.constant 0 : index
    %c0_8 = arith.constant 0 : index
    %7 = vector.load %arg4[%c0_7, %c0_8] : memref<1x64xf32, #tpu.memory_space<vmem>>, vector<1x64xf32>
    %8 = vector.broadcast %7 : vector<1x64xf32> to vector<64x64xf32>
    %9 = arith.addf %6, %8 : vector<64x64xf32>
    %cst_9 = arith.constant 0.000000e+00 : f32
    %10 = vector.broadcast %cst_9 : f32 to vector<64x64xf32>
    %11 = arith.maximumf %9, %10 : vector<64x64xf32>
    %c0_10 = arith.constant 0 : index
    %c0_11 = arith.constant 0 : index
    %12 = vector.load %arg5[%c0_10, %c0_11] : memref<64x256xf32, #tpu.memory_space<vmem>>, vector<64x256xf32>
    %cst_12 = arith.constant dense<0.000000e+00> : vector<64x256xf32>
    %13 = tpu.matmul %11, %12, %cst_12 {dimension_numbers = #tpu.dot_dimension_numbers<[1], [0], [0], [1], [0, 0, 1, 1], [], []>} : vector<64x64xf32>, vector<64x256xf32>, vector<64x256xf32> -> vector<64x256xf32>
    %c0_13 = arith.constant 0 : index
    %c0_14 = arith.constant 0 : index
    %14 = vector.load %arg6[%c0_13, %c0_14] : memref<1x256xf32, #tpu.memory_space<vmem>>, vector<1x256xf32>
    %15 = vector.broadcast %14 : vector<1x256xf32> to vector<64x256xf32>
    %16 = arith.addf %13, %15 : vector<64x256xf32>
    %c0_15 = arith.constant 0 : index
    %c0_16 = arith.constant 0 : index
    %c0_17 = arith.constant 0 : index
    %17 = vector.load %arg1[%c0_15, %c0_16, %c0_17] : memref<2x8x64xf32, #tpu.memory_space<vmem>>, vector<1x8x64xf32>
    %18 = vector.shape_cast %17 : vector<1x8x64xf32> to vector<8x64xf32>
    %c0_18 = arith.constant 0 : index
    %c0_19 = arith.constant 0 : index
    %c0_20 = arith.constant 0 : index
    %19 = vector.load %arg2[%c0_18, %c0_19, %c0_20] : memref<2x8x64xf32, #tpu.memory_space<vmem>>, vector<1x8x64xf32>
    %20 = vector.shape_cast %19 : vector<1x8x64xf32> to vector<8x64xf32>
    %c1 = arith.constant 1 : index
    %c0_21 = arith.constant 0 : index
    %c0_22 = arith.constant 0 : index
    %21 = vector.load %arg1[%c1, %c0_21, %c0_22] : memref<2x8x64xf32, #tpu.memory_space<vmem>>, vector<1x8x64xf32>
    %22 = vector.shape_cast %21 : vector<1x8x64xf32> to vector<8x64xf32>
    %c1_23 = arith.constant 1 : index
    %c0_24 = arith.constant 0 : index
    %c0_25 = arith.constant 0 : index
    %23 = vector.load %arg2[%c1_23, %c0_24, %c0_25] : memref<2x8x64xf32, #tpu.memory_space<vmem>>, vector<1x8x64xf32>
    %24 = vector.shape_cast %23 : vector<1x8x64xf32> to vector<8x64xf32>
    %25 = tpu.concatenate %18, %22 in 1 : vector<8x64xf32>, vector<8x64xf32> -> vector<8x128xf32>
    %cst_26 = arith.constant dense<0.000000e+00> : vector<8x512xf32>
    %26 = tpu.matmul %25, %0, %cst_26 {dimension_numbers = #tpu.dot_dimension_numbers<[1], [0], [0], [1], [0, 0, 1, 1], [], []>} : vector<8x128xf32>, vector<128x512xf32>, vector<8x512xf32> -> vector<8x512xf32>
    %27 = vector.extract_strided_slice %26 {offsets = [0, 0], sizes = [8, 256], strides = [1, 1]} : vector<8x512xf32> to vector<8x256xf32>
    %28 = vector.extract_strided_slice %16 {offsets = [0, 0], sizes = [8, 256], strides = [1, 1]} : vector<64x256xf32> to vector<8x256xf32>
    %29 = arith.addf %27, %28 : vector<8x256xf32>
    %30 = arith.negf %29 : vector<8x256xf32>
    %31 = math.exp %30 : vector<8x256xf32>
    %cst_27 = arith.constant 1.000000e+00 : f32
    %32 = vector.broadcast %cst_27 : f32 to vector<8x256xf32>
    %33 = arith.addf %32, %31 : vector<8x256xf32>
    %34 = arith.divf %32, %33 : vector<8x256xf32>
    %35 = vector.extract_strided_slice %34 {offsets = [0, 0], sizes = [8, 64], strides = [1, 1]} : vector<8x256xf32> to vector<8x64xf32>
    %36 = vector.extract_strided_slice %34 {offsets = [0, 64], sizes = [8, 64], strides = [1, 1]} : vector<8x256xf32> to vector<8x64xf32>
    %37 = vector.extract_strided_slice %34 {offsets = [0, 192], sizes = [8, 64], strides = [1, 1]} : vector<8x256xf32> to vector<8x64xf32>
    %38 = vector.extract_strided_slice %29 {offsets = [0, 128], sizes = [8, 64], strides = [1, 1]} : vector<8x256xf32> to vector<8x64xf32>
    %39 = math.tanh %38 : vector<8x64xf32>
    %40 = arith.mulf %36, %20 : vector<8x64xf32>
    %41 = arith.mulf %35, %39 : vector<8x64xf32>
    %42 = arith.addf %40, %41 : vector<8x64xf32>
    %43 = math.tanh %42 : vector<8x64xf32>
    %44 = arith.mulf %37, %43 : vector<8x64xf32>
    %45 = tpu.concatenate %44, %22 in 1 : vector<8x64xf32>, vector<8x64xf32> -> vector<8x128xf32>
    %cst_28 = arith.constant dense<0.000000e+00> : vector<8x512xf32>
    %46 = tpu.matmul %45, %0, %cst_28 {dimension_numbers = #tpu.dot_dimension_numbers<[1], [0], [0], [1], [0, 0, 1, 1], [], []>} : vector<8x128xf32>, vector<128x512xf32>, vector<8x512xf32> -> vector<8x512xf32>
    %47 = vector.extract_strided_slice %46 {offsets = [0, 0], sizes = [8, 256], strides = [1, 1]} : vector<8x512xf32> to vector<8x256xf32>
    %48 = vector.extract_strided_slice %16 {offsets = [8, 0], sizes = [8, 256], strides = [1, 1]} : vector<64x256xf32> to vector<8x256xf32>
    %49 = arith.addf %47, %48 : vector<8x256xf32>
    %50 = arith.negf %49 : vector<8x256xf32>
    %51 = math.exp %50 : vector<8x256xf32>
    %cst_29 = arith.constant 1.000000e+00 : f32
    %52 = vector.broadcast %cst_29 : f32 to vector<8x256xf32>
    %53 = arith.addf %52, %51 : vector<8x256xf32>
    %54 = arith.divf %52, %53 : vector<8x256xf32>
    %55 = vector.extract_strided_slice %54 {offsets = [0, 0], sizes = [8, 64], strides = [1, 1]} : vector<8x256xf32> to vector<8x64xf32>
    %56 = vector.extract_strided_slice %54 {offsets = [0, 64], sizes = [8, 64], strides = [1, 1]} : vector<8x256xf32> to vector<8x64xf32>
    %57 = vector.extract_strided_slice %54 {offsets = [0, 192], sizes = [8, 64], strides = [1, 1]} : vector<8x256xf32> to vector<8x64xf32>
    %58 = vector.extract_strided_slice %49 {offsets = [0, 128], sizes = [8, 64], strides = [1, 1]} : vector<8x256xf32> to vector<8x64xf32>
    %59 = math.tanh %58 : vector<8x64xf32>
    %60 = arith.mulf %56, %42 : vector<8x64xf32>
    %61 = arith.mulf %55, %59 : vector<8x64xf32>
    %62 = arith.addf %60, %61 : vector<8x64xf32>
    %63 = math.tanh %62 : vector<8x64xf32>
    %64 = arith.mulf %57, %63 : vector<8x64xf32>
    %65 = vector.extract_strided_slice %46 {offsets = [0, 256], sizes = [8, 256], strides = [1, 1]} : vector<8x512xf32> to vector<8x256xf32>
    %66 = arith.addf %65, %3 : vector<8x256xf32>
    %67 = arith.negf %66 : vector<8x256xf32>
    %68 = math.exp %67 : vector<8x256xf32>
    %cst_30 = arith.constant 1.000000e+00 : f32
    %69 = vector.broadcast %cst_30 : f32 to vector<8x256xf32>
    %70 = arith.addf %69, %68 : vector<8x256xf32>
    %71 = arith.divf %69, %70 : vector<8x256xf32>
    %72 = vector.extract_strided_slice %71 {offsets = [0, 0], sizes = [8, 64], strides = [1, 1]} : vector<8x256xf32> to vector<8x64xf32>
    %73 = vector.extract_strided_slice %71 {offsets = [0, 64], sizes = [8, 64], strides = [1, 1]} : vector<8x256xf32> to vector<8x64xf32>
    %74 = vector.extract_strided_slice %71 {offsets = [0, 192], sizes = [8, 64], strides = [1, 1]} : vector<8x256xf32> to vector<8x64xf32>
    %75 = vector.extract_strided_slice %66 {offsets = [0, 128], sizes = [8, 64], strides = [1, 1]} : vector<8x256xf32> to vector<8x64xf32>
    %76 = math.tanh %75 : vector<8x64xf32>
    %77 = arith.mulf %73, %24 : vector<8x64xf32>
    %78 = arith.mulf %72, %76 : vector<8x64xf32>
    %79 = arith.addf %77, %78 : vector<8x64xf32>
    %80 = math.tanh %79 : vector<8x64xf32>
    %81 = arith.mulf %74, %80 : vector<8x64xf32>
    %82 = vector.extract_strided_slice %81 {offsets = [1, 0], sizes = [1, 64], strides = [1, 1]} : vector<8x64xf32> to vector<1x64xf32>
    %c0_31 = arith.constant 0 : index
    %c0_32 = arith.constant 0 : index
    %83 = vector.load %arg12[%c0_31, %c0_32] : memref<8x64xf32, #tpu.memory_space<vmem>>, vector<1x64xf32>
    tpu.vector_store %arg12[%c0_31, %c0_32], %82 {strides = array<i32>} : memref<8x64xf32, #tpu.memory_space<vmem>>, vector<1x64xf32>,
    %84 = tpu.concatenate %64, %81 in 1 : vector<8x64xf32>, vector<8x64xf32> -> vector<8x128xf32>
    %cst_33 = arith.constant dense<0.000000e+00> : vector<8x512xf32>
    %85 = tpu.matmul %84, %0, %cst_33 {dimension_numbers = #tpu.dot_dimension_numbers<[1], [0], [0], [1], [0, 0, 1, 1], [], []>} : vector<8x128xf32>, vector<128x512xf32>, vector<8x512xf32> -> vector<8x512xf32>
    %86 = vector.extract_strided_slice %85 {offsets = [0, 0], sizes = [8, 256], strides = [1, 1]} : vector<8x512xf32> to vector<8x256xf32>
    %87 = vector.extract_strided_slice %16 {offsets = [16, 0], sizes = [8, 256], strides = [1, 1]} : vector<64x256xf32> to vector<8x256xf32>
    %88 = arith.addf %86, %87 : vector<8x256xf32>
    %89 = arith.negf %88 : vector<8x256xf32>
    %90 = math.exp %89 : vector<8x256xf32>
    %cst_34 = arith.constant 1.000000e+00 : f32
    %91 = vector.broadcast %cst_34 : f32 to vector<8x256xf32>
    %92 = arith.addf %91, %90 : vector<8x256xf32>
    %93 = arith.divf %91, %92 : vector<8x256xf32>
    %94 = vector.extract_strided_slice %93 {offsets = [0, 0], sizes = [8, 64], strides = [1, 1]} : vector<8x256xf32> to vector<8x64xf32>
    %95 = vector.extract_strided_slice %93 {offsets = [0, 64], sizes = [8, 64], strides = [1, 1]} : vector<8x256xf32> to vector<8x64xf32>
    %96 = vector.extract_strided_slice %93 {offsets = [0, 192], sizes = [8, 64], strides = [1, 1]} : vector<8x256xf32> to vector<8x64xf32>
    %97 = vector.extract_strided_slice %88 {offsets = [0, 128], sizes = [8, 64], strides = [1, 1]} : vector<8x256xf32> to vector<8x64xf32>
    %98 = math.tanh %97 : vector<8x64xf32>
    %99 = arith.mulf %95, %62 : vector<8x64xf32>
    %100 = arith.mulf %94, %98 : vector<8x64xf32>
    %101 = arith.addf %99, %100 : vector<8x64xf32>
    %102 = math.tanh %101 : vector<8x64xf32>
    %103 = arith.mulf %96, %102 : vector<8x64xf32>
    %104 = vector.extract_strided_slice %85 {offsets = [0, 256], sizes = [8, 256], strides = [1, 1]} : vector<8x512xf32> to vector<8x256xf32>
    %105 = arith.addf %104, %3 : vector<8x256xf32>
    %106 = arith.negf %105 : vector<8x256xf32>
    %107 = math.exp %106 : vector<8x256xf32>
    %cst_35 = arith.constant 1.000000e+00 : f32
    %108 = vector.broadcast %cst_35 : f32 to vector<8x256xf32>
    %109 = arith.addf %108, %107 : vector<8x256xf32>
    %110 = arith.divf %108, %109 : vector<8x256xf32>
    %111 = vector.extract_strided_slice %110 {offsets = [0, 0], sizes = [8, 64], strides = [1, 1]} : vector<8x256xf32> to vector<8x64xf32>
    %112 = vector.extract_strided_slice %110 {offsets = [0, 64], sizes = [8, 64], strides = [1, 1]} : vector<8x256xf32> to vector<8x64xf32>
    %113 = vector.extract_strided_slice %110 {offsets = [0, 192], sizes = [8, 64], strides = [1, 1]} : vector<8x256xf32> to vector<8x64xf32>
    %114 = vector.extract_strided_slice %105 {offsets = [0, 128], sizes = [8, 64], strides = [1, 1]} : vector<8x256xf32> to vector<8x64xf32>
    %115 = math.tanh %114 : vector<8x64xf32>
    %116 = arith.mulf %112, %79 : vector<8x64xf32>
    %117 = arith.mulf %111, %115 : vector<8x64xf32>
    %118 = arith.addf %116, %117 : vector<8x64xf32>
    %119 = math.tanh %118 : vector<8x64xf32>
    %120 = arith.mulf %113, %119 : vector<8x64xf32>
    %121 = vector.extract_strided_slice %120 {offsets = [1, 0], sizes = [1, 64], strides = [1, 1]} : vector<8x64xf32> to vector<1x64xf32>
    %c1_36 = arith.constant 1 : index
    %c0_37 = arith.constant 0 : index
    %122 = vector.load %arg12[%c1_36, %c0_37] : memref<8x64xf32, #tpu.memory_space<vmem>>, vector<1x64xf32>
    tpu.vector_store %arg12[%c1_36, %c0_37], %121 {strides = array<i32>} : memref<8x64xf32, #tpu.memory_space<vmem>>, vector<1x64xf32>,
    %123 = tpu.concatenate %103, %120 in 1 : vector<8x64xf32>, vector<8x64xf32> -> vector<8x128xf32>
    %cst_38 = arith.constant dense<0.000000e+00> : vector<8x512xf32>
    %124 = tpu.matmul %123, %0, %cst_38 {dimension_numbers = #tpu.dot_dimension_numbers<[1], [0], [0], [1], [0, 0, 1, 1], [], []>} : vector<8x128xf32>, vector<128x512xf32>, vector<8x512xf32> -> vector<8x512xf32>
    %125 = vector.extract_strided_slice %124 {offsets = [0, 0], sizes = [8, 256], strides = [1, 1]} : vector<8x512xf32> to vector<8x256xf32>
    %126 = vector.extract_strided_slice %16 {offsets = [24, 0], sizes = [8, 256], strides = [1, 1]} : vector<64x256xf32> to vector<8x256xf32>
    %127 = arith.addf %125, %126 : vector<8x256xf32>
    %128 = arith.negf %127 : vector<8x256xf32>
    %129 = math.exp %128 : vector<8x256xf32>
    %cst_39 = arith.constant 1.000000e+00 : f32
    %130 = vector.broadcast %cst_39 : f32 to vector<8x256xf32>
    %131 = arith.addf %130, %129 : vector<8x256xf32>
    %132 = arith.divf %130, %131 : vector<8x256xf32>
    %133 = vector.extract_strided_slice %132 {offsets = [0, 0], sizes = [8, 64], strides = [1, 1]} : vector<8x256xf32> to vector<8x64xf32>
    %134 = vector.extract_strided_slice %132 {offsets = [0, 64], sizes = [8, 64], strides = [1, 1]} : vector<8x256xf32> to vector<8x64xf32>
    %135 = vector.extract_strided_slice %132 {offsets = [0, 192], sizes = [8, 64], strides = [1, 1]} : vector<8x256xf32> to vector<8x64xf32>
    %136 = vector.extract_strided_slice %127 {offsets = [0, 128], sizes = [8, 64], strides = [1, 1]} : vector<8x256xf32> to vector<8x64xf32>
    %137 = math.tanh %136 : vector<8x64xf32>
    %138 = arith.mulf %134, %101 : vector<8x64xf32>
    %139 = arith.mulf %133, %137 : vector<8x64xf32>
    %140 = arith.addf %138, %139 : vector<8x64xf32>
    %141 = math.tanh %140 : vector<8x64xf32>
    %142 = arith.mulf %135, %141 : vector<8x64xf32>
    %143 = vector.extract_strided_slice %124 {offsets = [0, 256], sizes = [8, 256], strides = [1, 1]} : vector<8x512xf32> to vector<8x256xf32>
    %144 = arith.addf %143, %3 : vector<8x256xf32>
    %145 = arith.negf %144 : vector<8x256xf32>
    %146 = math.exp %145 : vector<8x256xf32>
    %cst_40 = arith.constant 1.000000e+00 : f32
    %147 = vector.broadcast %cst_40 : f32 to vector<8x256xf32>
    %148 = arith.addf %147, %146 : vector<8x256xf32>
    %149 = arith.divf %147, %148 : vector<8x256xf32>
    %150 = vector.extract_strided_slice %149 {offsets = [0, 0], sizes = [8, 64], strides = [1, 1]} : vector<8x256xf32> to vector<8x64xf32>
    %151 = vector.extract_strided_slice %149 {offsets = [0, 64], sizes = [8, 64], strides = [1, 1]} : vector<8x256xf32> to vector<8x64xf32>
    %152 = vector.extract_strided_slice %149 {offsets = [0, 192], sizes = [8, 64], strides = [1, 1]} : vector<8x256xf32> to vector<8x64xf32>
    %153 = vector.extract_strided_slice %144 {offsets = [0, 128], sizes = [8, 64], strides = [1, 1]} : vector<8x256xf32> to vector<8x64xf32>
    %154 = math.tanh %153 : vector<8x64xf32>
    %155 = arith.mulf %151, %118 : vector<8x64xf32>
    %156 = arith.mulf %150, %154 : vector<8x64xf32>
    %157 = arith.addf %155, %156 : vector<8x64xf32>
    %158 = math.tanh %157 : vector<8x64xf32>
    %159 = arith.mulf %152, %158 : vector<8x64xf32>
    %160 = vector.extract_strided_slice %159 {offsets = [1, 0], sizes = [1, 64], strides = [1, 1]} : vector<8x64xf32> to vector<1x64xf32>
    %c2 = arith.constant 2 : index
    %c0_41 = arith.constant 0 : index
    %161 = vector.load %arg12[%c2, %c0_41] : memref<8x64xf32, #tpu.memory_space<vmem>>, vector<1x64xf32>
    tpu.vector_store %arg12[%c2, %c0_41], %160 {strides = array<i32>} : memref<8x64xf32, #tpu.memory_space<vmem>>, vector<1x64xf32>,
    %162 = tpu.concatenate %142, %159 in 1 : vector<8x64xf32>, vector<8x64xf32> -> vector<8x128xf32>
    %cst_42 = arith.constant dense<0.000000e+00> : vector<8x512xf32>
    %163 = tpu.matmul %162, %0, %cst_42 {dimension_numbers = #tpu.dot_dimension_numbers<[1], [0], [0], [1], [0, 0, 1, 1], [], []>} : vector<8x128xf32>, vector<128x512xf32>, vector<8x512xf32> -> vector<8x512xf32>
    %164 = vector.extract_strided_slice %163 {offsets = [0, 0], sizes = [8, 256], strides = [1, 1]} : vector<8x512xf32> to vector<8x256xf32>
    %165 = vector.extract_strided_slice %16 {offsets = [32, 0], sizes = [8, 256], strides = [1, 1]} : vector<64x256xf32> to vector<8x256xf32>
    %166 = arith.addf %164, %165 : vector<8x256xf32>
    %167 = arith.negf %166 : vector<8x256xf32>
    %168 = math.exp %167 : vector<8x256xf32>
    %cst_43 = arith.constant 1.000000e+00 : f32
    %169 = vector.broadcast %cst_43 : f32 to vector<8x256xf32>
    %170 = arith.addf %169, %168 : vector<8x256xf32>
    %171 = arith.divf %169, %170 : vector<8x256xf32>
    %172 = vector.extract_strided_slice %171 {offsets = [0, 0], sizes = [8, 64], strides = [1, 1]} : vector<8x256xf32> to vector<8x64xf32>
    %173 = vector.extract_strided_slice %171 {offsets = [0, 64], sizes = [8, 64], strides = [1, 1]} : vector<8x256xf32> to vector<8x64xf32>
    %174 = vector.extract_strided_slice %171 {offsets = [0, 192], sizes = [8, 64], strides = [1, 1]} : vector<8x256xf32> to vector<8x64xf32>
    %175 = vector.extract_strided_slice %166 {offsets = [0, 128], sizes = [8, 64], strides = [1, 1]} : vector<8x256xf32> to vector<8x64xf32>
    %176 = math.tanh %175 : vector<8x64xf32>
    %177 = arith.mulf %173, %140 : vector<8x64xf32>
    %178 = arith.mulf %172, %176 : vector<8x64xf32>
    %179 = arith.addf %177, %178 : vector<8x64xf32>
    %180 = math.tanh %179 : vector<8x64xf32>
    %181 = arith.mulf %174, %180 : vector<8x64xf32>
    %182 = vector.extract_strided_slice %163 {offsets = [0, 256], sizes = [8, 256], strides = [1, 1]} : vector<8x512xf32> to vector<8x256xf32>
    %183 = arith.addf %182, %3 : vector<8x256xf32>
    %184 = arith.negf %183 : vector<8x256xf32>
    %185 = math.exp %184 : vector<8x256xf32>
    %cst_44 = arith.constant 1.000000e+00 : f32
    %186 = vector.broadcast %cst_44 : f32 to vector<8x256xf32>
    %187 = arith.addf %186, %185 : vector<8x256xf32>
    %188 = arith.divf %186, %187 : vector<8x256xf32>
    %189 = vector.extract_strided_slice %188 {offsets = [0, 0], sizes = [8, 64], strides = [1, 1]} : vector<8x256xf32> to vector<8x64xf32>
    %190 = vector.extract_strided_slice %188 {offsets = [0, 64], sizes = [8, 64], strides = [1, 1]} : vector<8x256xf32> to vector<8x64xf32>
    %191 = vector.extract_strided_slice %188 {offsets = [0, 192], sizes = [8, 64], strides = [1, 1]} : vector<8x256xf32> to vector<8x64xf32>
    %192 = vector.extract_strided_slice %183 {offsets = [0, 128], sizes = [8, 64], strides = [1, 1]} : vector<8x256xf32> to vector<8x64xf32>
    %193 = math.tanh %192 : vector<8x64xf32>
    %194 = arith.mulf %190, %157 : vector<8x64xf32>
    %195 = arith.mulf %189, %193 : vector<8x64xf32>
    %196 = arith.addf %194, %195 : vector<8x64xf32>
    %197 = math.tanh %196 : vector<8x64xf32>
    %198 = arith.mulf %191, %197 : vector<8x64xf32>
    %199 = vector.extract_strided_slice %198 {offsets = [1, 0], sizes = [1, 64], strides = [1, 1]} : vector<8x64xf32> to vector<1x64xf32>
    %c3 = arith.constant 3 : index
    %c0_45 = arith.constant 0 : index
    %200 = vector.load %arg12[%c3, %c0_45] : memref<8x64xf32, #tpu.memory_space<vmem>>, vector<1x64xf32>
    tpu.vector_store %arg12[%c3, %c0_45], %199 {strides = array<i32>} : memref<8x64xf32, #tpu.memory_space<vmem>>, vector<1x64xf32>,
    %201 = tpu.concatenate %181, %198 in 1 : vector<8x64xf32>, vector<8x64xf32> -> vector<8x128xf32>
    %cst_46 = arith.constant dense<0.000000e+00> : vector<8x512xf32>
    %202 = tpu.matmul %201, %0, %cst_46 {dimension_numbers = #tpu.dot_dimension_numbers<[1], [0], [0], [1], [0, 0, 1, 1], [], []>} : vector<8x128xf32>, vector<128x512xf32>, vector<8x512xf32> -> vector<8x512xf32>
    %203 = vector.extract_strided_slice %202 {offsets = [0, 0], sizes = [8, 256], strides = [1, 1]} : vector<8x512xf32> to vector<8x256xf32>
    %204 = vector.extract_strided_slice %16 {offsets = [40, 0], sizes = [8, 256], strides = [1, 1]} : vector<64x256xf32> to vector<8x256xf32>
    %205 = arith.addf %203, %204 : vector<8x256xf32>
    %206 = arith.negf %205 : vector<8x256xf32>
    %207 = math.exp %206 : vector<8x256xf32>
    %cst_47 = arith.constant 1.000000e+00 : f32
    %208 = vector.broadcast %cst_47 : f32 to vector<8x256xf32>
    %209 = arith.addf %208, %207 : vector<8x256xf32>
    %210 = arith.divf %208, %209 : vector<8x256xf32>
    %211 = vector.extract_strided_slice %210 {offsets = [0, 0], sizes = [8, 64], strides = [1, 1]} : vector<8x256xf32> to vector<8x64xf32>
    %212 = vector.extract_strided_slice %210 {offsets = [0, 64], sizes = [8, 64], strides = [1, 1]} : vector<8x256xf32> to vector<8x64xf32>
    %213 = vector.extract_strided_slice %210 {offsets = [0, 192], sizes = [8, 64], strides = [1, 1]} : vector<8x256xf32> to vector<8x64xf32>
    %214 = vector.extract_strided_slice %205 {offsets = [0, 128], sizes = [8, 64], strides = [1, 1]} : vector<8x256xf32> to vector<8x64xf32>
    %215 = math.tanh %214 : vector<8x64xf32>
    %216 = arith.mulf %212, %179 : vector<8x64xf32>
    %217 = arith.mulf %211, %215 : vector<8x64xf32>
    %218 = arith.addf %216, %217 : vector<8x64xf32>
    %219 = math.tanh %218 : vector<8x64xf32>
    %220 = arith.mulf %213, %219 : vector<8x64xf32>
    %221 = vector.extract_strided_slice %202 {offsets = [0, 256], sizes = [8, 256], strides = [1, 1]} : vector<8x512xf32> to vector<8x256xf32>
    %222 = arith.addf %221, %3 : vector<8x256xf32>
    %223 = arith.negf %222 : vector<8x256xf32>
    %224 = math.exp %223 : vector<8x256xf32>
    %cst_48 = arith.constant 1.000000e+00 : f32
    %225 = vector.broadcast %cst_48 : f32 to vector<8x256xf32>
    %226 = arith.addf %225, %224 : vector<8x256xf32>
    %227 = arith.divf %225, %226 : vector<8x256xf32>
    %228 = vector.extract_strided_slice %227 {offsets = [0, 0], sizes = [8, 64], strides = [1, 1]} : vector<8x256xf32> to vector<8x64xf32>
    %229 = vector.extract_strided_slice %227 {offsets = [0, 64], sizes = [8, 64], strides = [1, 1]} : vector<8x256xf32> to vector<8x64xf32>
    %230 = vector.extract_strided_slice %227 {offsets = [0, 192], sizes = [8, 64], strides = [1, 1]} : vector<8x256xf32> to vector<8x64xf32>
    %231 = vector.extract_strided_slice %222 {offsets = [0, 128], sizes = [8, 64], strides = [1, 1]} : vector<8x256xf32> to vector<8x64xf32>
    %232 = math.tanh %231 : vector<8x64xf32>
    %233 = arith.mulf %229, %196 : vector<8x64xf32>
    %234 = arith.mulf %228, %232 : vector<8x64xf32>
    %235 = arith.addf %233, %234 : vector<8x64xf32>
    %236 = math.tanh %235 : vector<8x64xf32>
    %237 = arith.mulf %230, %236 : vector<8x64xf32>
    %238 = vector.extract_strided_slice %237 {offsets = [1, 0], sizes = [1, 64], strides = [1, 1]} : vector<8x64xf32> to vector<1x64xf32>
    %c4 = arith.constant 4 : index
    %c0_49 = arith.constant 0 : index
    %239 = vector.load %arg12[%c4, %c0_49] : memref<8x64xf32, #tpu.memory_space<vmem>>, vector<1x64xf32>
    tpu.vector_store %arg12[%c4, %c0_49], %238 {strides = array<i32>} : memref<8x64xf32, #tpu.memory_space<vmem>>, vector<1x64xf32>,
    %240 = tpu.concatenate %220, %237 in 1 : vector<8x64xf32>, vector<8x64xf32> -> vector<8x128xf32>
    %cst_50 = arith.constant dense<0.000000e+00> : vector<8x512xf32>
    %241 = tpu.matmul %240, %0, %cst_50 {dimension_numbers = #tpu.dot_dimension_numbers<[1], [0], [0], [1], [0, 0, 1, 1], [], []>} : vector<8x128xf32>, vector<128x512xf32>, vector<8x512xf32> -> vector<8x512xf32>
    %242 = vector.extract_strided_slice %241 {offsets = [0, 0], sizes = [8, 256], strides = [1, 1]} : vector<8x512xf32> to vector<8x256xf32>
    %243 = vector.extract_strided_slice %16 {offsets = [48, 0], sizes = [8, 256], strides = [1, 1]} : vector<64x256xf32> to vector<8x256xf32>
    %244 = arith.addf %242, %243 : vector<8x256xf32>
    %245 = arith.negf %244 : vector<8x256xf32>
    %246 = math.exp %245 : vector<8x256xf32>
    %cst_51 = arith.constant 1.000000e+00 : f32
    %247 = vector.broadcast %cst_51 : f32 to vector<8x256xf32>
    %248 = arith.addf %247, %246 : vector<8x256xf32>
    %249 = arith.divf %247, %248 : vector<8x256xf32>
    %250 = vector.extract_strided_slice %249 {offsets = [0, 0], sizes = [8, 64], strides = [1, 1]} : vector<8x256xf32> to vector<8x64xf32>
    %251 = vector.extract_strided_slice %249 {offsets = [0, 64], sizes = [8, 64], strides = [1, 1]} : vector<8x256xf32> to vector<8x64xf32>
    %252 = vector.extract_strided_slice %249 {offsets = [0, 192], sizes = [8, 64], strides = [1, 1]} : vector<8x256xf32> to vector<8x64xf32>
    %253 = vector.extract_strided_slice %244 {offsets = [0, 128], sizes = [8, 64], strides = [1, 1]} : vector<8x256xf32> to vector<8x64xf32>
    %254 = math.tanh %253 : vector<8x64xf32>
    %255 = arith.mulf %251, %218 : vector<8x64xf32>
    %256 = arith.mulf %250, %254 : vector<8x64xf32>
    %257 = arith.addf %255, %256 : vector<8x64xf32>
    %258 = math.tanh %257 : vector<8x64xf32>
    %259 = arith.mulf %252, %258 : vector<8x64xf32>
    %260 = vector.extract_strided_slice %241 {offsets = [0, 256], sizes = [8, 256], strides = [1, 1]} : vector<8x512xf32> to vector<8x256xf32>
    %261 = arith.addf %260, %3 : vector<8x256xf32>
    %262 = arith.negf %261 : vector<8x256xf32>
    %263 = math.exp %262 : vector<8x256xf32>
    %cst_52 = arith.constant 1.000000e+00 : f32
    %264 = vector.broadcast %cst_52 : f32 to vector<8x256xf32>
    %265 = arith.addf %264, %263 : vector<8x256xf32>
    %266 = arith.divf %264, %265 : vector<8x256xf32>
    %267 = vector.extract_strided_slice %266 {offsets = [0, 0], sizes = [8, 64], strides = [1, 1]} : vector<8x256xf32> to vector<8x64xf32>
    %268 = vector.extract_strided_slice %266 {offsets = [0, 64], sizes = [8, 64], strides = [1, 1]} : vector<8x256xf32> to vector<8x64xf32>
    %269 = vector.extract_strided_slice %266 {offsets = [0, 192], sizes = [8, 64], strides = [1, 1]} : vector<8x256xf32> to vector<8x64xf32>
    %270 = vector.extract_strided_slice %261 {offsets = [0, 128], sizes = [8, 64], strides = [1, 1]} : vector<8x256xf32> to vector<8x64xf32>
    %271 = math.tanh %270 : vector<8x64xf32>
    %272 = arith.mulf %268, %235 : vector<8x64xf32>
    %273 = arith.mulf %267, %271 : vector<8x64xf32>
    %274 = arith.addf %272, %273 : vector<8x64xf32>
    %275 = math.tanh %274 : vector<8x64xf32>
    %276 = arith.mulf %269, %275 : vector<8x64xf32>
    %277 = vector.extract_strided_slice %276 {offsets = [1, 0], sizes = [1, 64], strides = [1, 1]} : vector<8x64xf32> to vector<1x64xf32>
    %c5 = arith.constant 5 : index
    %c0_53 = arith.constant 0 : index
    %278 = vector.load %arg12[%c5, %c0_53] : memref<8x64xf32, #tpu.memory_space<vmem>>, vector<1x64xf32>
    tpu.vector_store %arg12[%c5, %c0_53], %277 {strides = array<i32>} : memref<8x64xf32, #tpu.memory_space<vmem>>, vector<1x64xf32>,
    %279 = tpu.concatenate %259, %276 in 1 : vector<8x64xf32>, vector<8x64xf32> -> vector<8x128xf32>
    %cst_54 = arith.constant dense<0.000000e+00> : vector<8x512xf32>
    %280 = tpu.matmul %279, %0, %cst_54 {dimension_numbers = #tpu.dot_dimension_numbers<[1], [0], [0], [1], [0, 0, 1, 1], [], []>} : vector<8x128xf32>, vector<128x512xf32>, vector<8x512xf32> -> vector<8x512xf32>
    %281 = vector.extract_strided_slice %280 {offsets = [0, 0], sizes = [8, 256], strides = [1, 1]} : vector<8x512xf32> to vector<8x256xf32>
    %282 = vector.extract_strided_slice %16 {offsets = [56, 0], sizes = [8, 256], strides = [1, 1]} : vector<64x256xf32> to vector<8x256xf32>
    %283 = arith.addf %281, %282 : vector<8x256xf32>
    %284 = arith.negf %283 : vector<8x256xf32>
    %285 = math.exp %284 : vector<8x256xf32>
    %cst_55 = arith.constant 1.000000e+00 : f32
    %286 = vector.broadcast %cst_55 : f32 to vector<8x256xf32>
    %287 = arith.addf %286, %285 : vector<8x256xf32>
    %288 = arith.divf %286, %287 : vector<8x256xf32>
    %289 = vector.extract_strided_slice %288 {offsets = [0, 0], sizes = [8, 64], strides = [1, 1]} : vector<8x256xf32> to vector<8x64xf32>
    %290 = vector.extract_strided_slice %288 {offsets = [0, 64], sizes = [8, 64], strides = [1, 1]} : vector<8x256xf32> to vector<8x64xf32>
    %291 = vector.extract_strided_slice %288 {offsets = [0, 192], sizes = [8, 64], strides = [1, 1]} : vector<8x256xf32> to vector<8x64xf32>
    %292 = vector.extract_strided_slice %283 {offsets = [0, 128], sizes = [8, 64], strides = [1, 1]} : vector<8x256xf32> to vector<8x64xf32>
    %293 = math.tanh %292 : vector<8x64xf32>
    %294 = arith.mulf %290, %257 : vector<8x64xf32>
    %295 = arith.mulf %289, %293 : vector<8x64xf32>
    %296 = arith.addf %294, %295 : vector<8x64xf32>
    %297 = math.tanh %296 : vector<8x64xf32>
    %298 = arith.mulf %291, %297 : vector<8x64xf32>
    %299 = vector.extract_strided_slice %280 {offsets = [0, 256], sizes = [8, 256], strides = [1, 1]} : vector<8x512xf32> to vector<8x256xf32>
    %300 = arith.addf %299, %3 : vector<8x256xf32>
    %301 = arith.negf %300 : vector<8x256xf32>
    %302 = math.exp %301 : vector<8x256xf32>
    %cst_56 = arith.constant 1.000000e+00 : f32
    %303 = vector.broadcast %cst_56 : f32 to vector<8x256xf32>
    %304 = arith.addf %303, %302 : vector<8x256xf32>
    %305 = arith.divf %303, %304 : vector<8x256xf32>
    %306 = vector.extract_strided_slice %305 {offsets = [0, 0], sizes = [8, 64], strides = [1, 1]} : vector<8x256xf32> to vector<8x64xf32>
    %307 = vector.extract_strided_slice %305 {offsets = [0, 64], sizes = [8, 64], strides = [1, 1]} : vector<8x256xf32> to vector<8x64xf32>
    %308 = vector.extract_strided_slice %305 {offsets = [0, 192], sizes = [8, 64], strides = [1, 1]} : vector<8x256xf32> to vector<8x64xf32>
    %309 = vector.extract_strided_slice %300 {offsets = [0, 128], sizes = [8, 64], strides = [1, 1]} : vector<8x256xf32> to vector<8x64xf32>
    %310 = math.tanh %309 : vector<8x64xf32>
    %311 = arith.mulf %307, %274 : vector<8x64xf32>
    %312 = arith.mulf %306, %310 : vector<8x64xf32>
    %313 = arith.addf %311, %312 : vector<8x64xf32>
    %314 = math.tanh %313 : vector<8x64xf32>
    %315 = arith.mulf %308, %314 : vector<8x64xf32>
    %316 = vector.extract_strided_slice %315 {offsets = [1, 0], sizes = [1, 64], strides = [1, 1]} : vector<8x64xf32> to vector<1x64xf32>
    %c6 = arith.constant 6 : index
    %c0_57 = arith.constant 0 : index
    %317 = vector.load %arg12[%c6, %c0_57] : memref<8x64xf32, #tpu.memory_space<vmem>>, vector<1x64xf32>
    tpu.vector_store %arg12[%c6, %c0_57], %316 {strides = array<i32>} : memref<8x64xf32, #tpu.memory_space<vmem>>, vector<1x64xf32>,
    %318 = tpu.concatenate %298, %315 in 1 : vector<8x64xf32>, vector<8x64xf32> -> vector<8x128xf32>
    %cst_58 = arith.constant dense<0.000000e+00> : vector<8x512xf32>
    %319 = tpu.matmul %318, %0, %cst_58 {dimension_numbers = #tpu.dot_dimension_numbers<[1], [0], [0], [1], [0, 0, 1, 1], [], []>} : vector<8x128xf32>, vector<128x512xf32>, vector<8x512xf32> -> vector<8x512xf32>
    %320 = vector.extract_strided_slice %319 {offsets = [0, 256], sizes = [8, 256], strides = [1, 1]} : vector<8x512xf32> to vector<8x256xf32>
    %321 = arith.addf %320, %3 : vector<8x256xf32>
    %322 = arith.negf %321 : vector<8x256xf32>
    %323 = math.exp %322 : vector<8x256xf32>
    %cst_59 = arith.constant 1.000000e+00 : f32
    %324 = vector.broadcast %cst_59 : f32 to vector<8x256xf32>
    %325 = arith.addf %324, %323 : vector<8x256xf32>
    %326 = arith.divf %324, %325 : vector<8x256xf32>
    %327 = vector.extract_strided_slice %326 {offsets = [0, 0], sizes = [8, 64], strides = [1, 1]} : vector<8x256xf32> to vector<8x64xf32>
    %328 = vector.extract_strided_slice %326 {offsets = [0, 64], sizes = [8, 64], strides = [1, 1]} : vector<8x256xf32> to vector<8x64xf32>
    %329 = vector.extract_strided_slice %326 {offsets = [0, 192], sizes = [8, 64], strides = [1, 1]} : vector<8x256xf32> to vector<8x64xf32>
    %330 = vector.extract_strided_slice %321 {offsets = [0, 128], sizes = [8, 64], strides = [1, 1]} : vector<8x256xf32> to vector<8x64xf32>
    %331 = math.tanh %330 : vector<8x64xf32>
    %332 = arith.mulf %328, %313 : vector<8x64xf32>
    %333 = arith.mulf %327, %331 : vector<8x64xf32>
    %334 = arith.addf %332, %333 : vector<8x64xf32>
    %335 = math.tanh %334 : vector<8x64xf32>
    %336 = arith.mulf %329, %335 : vector<8x64xf32>
    %337 = vector.extract_strided_slice %336 {offsets = [1, 0], sizes = [1, 64], strides = [1, 1]} : vector<8x64xf32> to vector<1x64xf32>
    %c7 = arith.constant 7 : index
    %c0_60 = arith.constant 0 : index
    %338 = vector.load %arg12[%c7, %c0_60] : memref<8x64xf32, #tpu.memory_space<vmem>>, vector<1x64xf32>
    tpu.vector_store %arg12[%c7, %c0_60], %337 {strides = array<i32>} : memref<8x64xf32, #tpu.memory_space<vmem>>, vector<1x64xf32>,
    %c0_61 = arith.constant 0 : index
    %c0_62 = arith.constant 0 : index
    %339 = vector.load %arg12[%c0_61, %c0_62] : memref<8x64xf32, #tpu.memory_space<vmem>>, vector<8x64xf32>
    %c0_63 = arith.constant 0 : index
    %c0_64 = arith.constant 0 : index
    %340 = vector.load %arg9[%c0_63, %c0_64] : memref<64x128xf32, #tpu.memory_space<vmem>>, vector<64x128xf32>
    %cst_65 = arith.constant dense<0.000000e+00> : vector<8x128xf32>
    %341 = tpu.matmul %339, %340, %cst_65 {dimension_numbers = #tpu.dot_dimension_numbers<[1], [0], [0], [1], [0, 0, 1, 1], [], []>} : vector<8x64xf32>, vector<64x128xf32>, vector<8x128xf32> -> vector<8x128xf32>
    %c0_66 = arith.constant 0 : index
    %c0_67 = arith.constant 0 : index
    %342 = vector.load %arg10[%c0_66, %c0_67] : memref<1x128xf32, #tpu.memory_space<vmem>>, vector<1x128xf32>
    %343 = vector.broadcast %342 : vector<1x128xf32> to vector<8x128xf32>
    %344 = arith.addf %341, %343 : vector<8x128xf32>
    %345 = arith.negf %344 : vector<8x128xf32>
    %346 = math.exp %345 : vector<8x128xf32>
    %cst_68 = arith.constant 1.000000e+00 : f32
    %347 = vector.broadcast %cst_68 : f32 to vector<8x128xf32>
    %348 = arith.addf %347, %346 : vector<8x128xf32>
    %349 = arith.divf %347, %348 : vector<8x128xf32>
    %c0_69 = arith.constant 0 : index
    %c0_70 = arith.constant 0 : index
    %350 = vector.load %arg11[%c0_69, %c0_70] : memref<8x128xf32, #tpu.memory_space<vmem>>, vector<8x128xf32>
    tpu.vector_store %arg11[%c0_69, %c0_70], %349 {strides = array<i32>} : memref<8x128xf32, #tpu.memory_space<vmem>>, vector<8x128xf32>,
    return
  }
}

</mosaic_0001>

<bundles_post_ra>
// kernel: tpu_custom_call.1
= control target key start
LH: loop header
LB: loop body
LE: loop exit
PB: predicated region body
PF: predicated region fallthrough
CT: control target
= control target key end

     0   :  { %16 = vsyncpa [#allocation4], 0  ;;  %s3986_s0 = inlined_call_operand.vmem [shape: f32[64,36], index: 0, kind: input, shape index: {}]   ;;  %s3987_s1 = inlined_call_operand.vmem [shape: f32[2,8,64], index: 1, kind: input, shape index: {}]   ;;  %s3988_s2 = inlined_call_operand.hbm [shape: f32[2,8,64], index: 2, kind: input, shape index: {}]   ;;  %s3989_s3 = inlined_call_operand.vmem [shape: f32[36,64], index: 3, kind: input, shape index: {}]   ;;  %s3990_s4 = inlined_call_operand.vmem [shape: f32[1,64], index: 4, kind: input, shape index: {}]   ;;  %s3991_s5 = inlined_call_operand.hbm [shape: f32[64,256], index: 5, kind: input, shape index: {}]   ;;  %s3992_s6 = inlined_call_operand.vmem [shape: f32[1,256], index: 6, kind: input, shape index: {}]   ;;  %s3993_s7 = inlined_call_operand.hbm [shape: f32[128,512], index: 7, kind: input, shape index: {}]   ;;  %s3994_s8 = inlined_call_operand.vmem [shape: f32[1,256], index: 8, kind: input, shape index: {}]   ;;  %s3995_s9 = inlined_call_operand.vmem [shape: f32[64,128], index: 9, kind: input, shape index: {}]   ;;  %s3996_s10 = inlined_call_operand.vmem [shape: f32[1,128], index: 10, kind: input, shape index: {}]   ;;  %s3997_s11 = inlined_call_operand.hbm [shape: f32[8,128], index: 11, kind: output, shape index: {}]  }
   0x1   :  { %17 = vsyncpa [#allocation7], 0 }
   0x2   :  { %18 = vsyncpa [#allocation5], 0  ;;  %s3217_s17 = smov [#allocation6]   ;;  %s3123_s21 = scalar_lea.hbm %s3991_s5, 2048 }
   0x3   :  { %s44_s18 = sshll.u32 %s3217_s17, 4  ;;  %p3124_p0 = scmp.ne.s32.totalorder %s3991_s5, %s3123_s21  ;;  %s45_s18 = int_to_ptr.vmem [resolvable:$true] %s44_s18 }
   0x4   :  { %p3127_p1 = scmp.lt.u32.totalorder %s3123_s21, %s3991_s5 }
   0x6   :  { %p3129_p2 = pnand %p3127_p1, %p3124_p0 }
   0x8   :  { %3132 = shalt.err (!%p3129_p2)
}
   0x9   :  { %s3133_s26 = scalar_lea.vmem %s45_s18, 2048  ;;  %p3138_p4 = scmp.lt.s32.totalorder %s45_s18, %s45_s18 }
   0xa   :  { %p3134_p3 = scmp.ne.s32.totalorder %s45_s18, %s3133_s26  ;;  %p3139_p5 = scmp.lt.s32.totalorder %s3133_s26, %s3133_s26 }
   0xc   :  { %p3140_p6 = por %p3139_p5, %p3138_p4 }
   0xe   :  { %p3141_p7 = pnand %p3140_p6, %p3134_p3 }
  0x10   :  { %3144 = shalt.err (!%p3141_p7)
}
  0x11   :  { %s3218_s27 = smov 256   ;;  %s3219_s28 = smov 16  }
  0x12   :  { %50 = dma.hbm_to_vmem [thread:$0]  %s3991_s5, 2048, %s45_s18, [#allocation7], %s3218_s27, %s3218_s27, %s3219_s28  }
  0x13   :  { %s3220_s12 = smov [#allocation3]   ;;  %s3145_s16 = scalar_lea.hbm %s3988_s2, 256 }
  0x14   :  { %s28_s13 = sshll.u32 %s3220_s12, 4  ;;  %p3146_p8 = scmp.ne.s32.totalorder %s3988_s2, %s3145_s16  ;;  %s29_s13 = int_to_ptr.vmem [resolvable:$true] %s28_s13 }
  0x15   :  { %p3149_p9 = scmp.lt.u32.totalorder %s3145_s16, %s3988_s2 }
  0x17   :  { %p3151_p10 = pnand %p3149_p9, %p3146_p8 }
  0x19   :  { %3154 = shalt.err (!%p3151_p10)
}
  0x1a   :  { %s3155_s22 = scalar_lea.vmem %s29_s13, 256  ;;  %p3160_p12 = scmp.lt.s32.totalorder %s29_s13, %s29_s13 }
  0x1b   :  { %p3156_p11 = scmp.ne.s32.totalorder %s29_s13, %s3155_s22  ;;  %p3161_p13 = scmp.lt.s32.totalorder %s3155_s22, %s3155_s22 }
  0x1d   :  { %p3162_p0 = por %p3161_p13, %p3160_p12 }
  0x1f   :  { %p3163_p1 = pnand %p3162_p0, %p3156_p11 }
  0x21   :  { %3166 = shalt.err (!%p3163_p1)
}
  0x22   :  { %s3221_s5 = smov 128   ;;  %s3222_s18 = smov 8  }
  0x23   :  { %34 = dma.hbm_to_vmem [thread:$0]  %s3988_s2, 256, %s29_s13, [#allocation4], %s3221_s5, %s3221_s5, %s3222_s18  }
  0x24   :  { %s3223_s25 = smov [#allocation8]   ;;  %s3167_s29 = scalar_lea.hbm %s3993_s7, 8192 }
  0x25   :  { %s58_s26 = sshll.u32 %s3223_s25, 4  ;;  %p3168_p2 = scmp.ne.s32.totalorder %s3993_s7, %s3167_s29  ;;  %s59_s26 = int_to_ptr.vmem [resolvable:$true] %s58_s26 }
  0x26   :  { %p3171_p3 = scmp.lt.u32.totalorder %s3167_s29, %s3993_s7 }
  0x28   :  { %p3173_p4 = pnand %p3171_p3, %p3168_p2 }
  0x2a   :  { %3176 = shalt.err (!%p3173_p4)
}
  0x2b   :  { %s3177_s16 = scalar_lea.vmem %s59_s26, 8192  ;;  %p3182_p6 = scmp.lt.s32.totalorder %s59_s26, %s59_s26 }
  0x2c   :  { %p3178_p5 = scmp.ne.s32.totalorder %s59_s26, %s3177_s16  ;;  %p3183_p7 = scmp.lt.s32.totalorder %s3177_s16, %s3177_s16 }
  0x2e   :  { %p3184_p8 = por %p3183_p7, %p3182_p6 }
  0x30   :  { %p3185_p9 = pnand %p3184_p8, %p3178_p5 }
  0x32   :  { %3188 = shalt.err (!%p3185_p9)
}
  0x33   :  { %s3224_s2 = smov 512   ;;  %s3225_s13 = smov 32  }
  0x34   :  { %64 = dma.hbm_to_vmem [thread:$0]  %s3993_s7, 8192, %s59_s26, [#allocation7], %s3224_s2, %s3224_s2, %s3225_s13  }
  0x35   :  { %3211 = dma.done.wait [#allocation4], 256  }
  0x36   :  { %3212 = vsyncadd [#allocation4], 4294967040 }
  0x37   :  { %3213 = dma.done.wait [#allocation7], 10240  }
  0x38   :  { %3214 = vsyncadd [#allocation7], 4294957056  ;;  %vm176_vm0 = vcmask 293888   ;;  %v164_v0 = vld [vmem:[%s3989_s3] sm:$0xff]  ;;  %v165_v1 = vld [vmem:[%s3989_s3 + $0x8] sm:$0xff]  ;;  %s3226_s12 = smov 64  }
  0x39   :  { %v166_v2 = vld [vmem:[%s3989_s3 + $0x10] sm:$0xff]  ;;  %v2333_v3 = vpack.c.bf16 %v165_v1, %v164_v0  ;;  %v167_v4 = vld [vmem:[%s3989_s3 + $0x18] sm:$0xff]  ;;  %v156_v5 = vld [vmem:[%s3986_s0] sm:$0xff]  ;;  %vm201_vm1 = vcmask 1043456   ;;  %v3227_v43 = vmov 0.0   ;;  %vm346_vm2 = vcmask 523264  }
  0x3a   :  { %v2337_v6 = vpack.c.bf16 %v167_v4, %v166_v2  ;;  %2302 = vmatprep.mubr.msk.f32.mxu0 %vm176_vm0, %v156_v5  ;;  %v168_v7 = vld [vmem:[%s3989_s3 + $0x20] sm:$0xf]  ;;  %v2234_v8 = vld [vmem:[%s3987_s1 + $0x8] sm:$0xff]  ;;  %v321_v10 = vld [vmem:[#allocation6 + $0x18] sm:$0xff]  ;;  %435 = vmatprep.mubr.f32.mxu1 %v3227_v43  ;;  %vm797_vm3 = vcmask 517121   ;;  %vm3229_vm4 = vmmov 0  }
  0x3b   :  { %2334 = vmatprep.subr.bf16.mxu0 %v2333_v3  ;;  %v319_v9 = vld [vmem:[#allocation6 + $0x8] sm:$0xff]  ;;  %491 = vrot.lane.b32.xlu0 %v2234_v8, %s3226_s12  ;;  %v318_v11 = vld [vmem:[#allocation6] sm:$0xff]  ;;  %v320_v12 = vld [vmem:[#allocation6 + $0x10] sm:$0xff]  ;;  %s3230_s18 = smov [#allocation9]  }
  0x3c   :  { %2336 = vmatpush3.bf16.msra.mxu0 %v2333_v3  ;;  %v2341_v13 = vpack.c.bf16 %v321_v10, %v319_v9  ;;  %v2343_v14 = vpack.c.bf16 %v320_v12, %v318_v11  ;;  %v323_v15 = vld [vmem:[#allocation6 + $0x28] sm:$0xff]  ;;  %v325_v16 = vld [vmem:[#allocation6 + $0x38] sm:$0xff]  ;;  %v322_v17 = vld [vmem:[#allocation6 + $0x20] sm:$0xff] }
  0x3d   :  { %2338 = vmatprep.subr.bf16.mxu0 %v2337_v6  ;;  %v2345_v18 = vpack.c.bf16 %v325_v16, %v323_v15  ;;  %v324_v19 = vld [vmem:[#allocation6 + $0x30] sm:$0xff]  ;;  %v327_v20 = vld [vmem:[#allocation6 + $0x48] sm:$0xff]  ;;  %v329_v21 = vld [vmem:[#allocation6 + $0x58] sm:$0xff] }
  0x3e   :  { %2342 = vmatprep.subr.bf16.mxu1 %v2341_v13  ;;  %v2347_v22 = vpack.c.bf16 %v324_v19, %v322_v17  ;;  %v157_v23 = vld [vmem:[%s3986_s0 + $0x8] sm:$0xff]  ;;  %v2349_v24 = vpack.c.bf16 %v329_v21, %v327_v20  ;;  %v326_v25 = vld [vmem:[#allocation6 + $0x40] sm:$0xff]  ;;  %v158_v27 = vld [vmem:[%s3986_s0 + $0x10] sm:$0xff] }
  0x3f   :  { %2344 = vmatpush1.bf16.msra.mxu1 %v2343_v14  ;;  %v328_v26 = vld [vmem:[#allocation6 + $0x50] sm:$0xff]  ;;  %v159_v29 = vld [vmem:[%s3986_s0 + $0x18] sm:$0xff]  ;;  %v160_v30 = vld [vmem:[%s3986_s0 + $0x20] sm:$0xff] }
  0x40   :  { %2340 = vmatpush3.bf16.msra.mxu0 %v2337_v6  ;;  %2346 = vmatprep.subr.bf16.mxu1 %v2345_v18  ;;  %v2351_v28 = vpack.c.bf16 %v328_v26, %v326_v25  ;;  %v161_v31 = vld [vmem:[%s3986_s0 + $0x28] sm:$0xff]  ;;  %v162_v32 = vld [vmem:[%s3986_s0 + $0x30] sm:$0xff]  ;;  %v163_v33 = vld [vmem:[%s3986_s0 + $0x38] sm:$0xff] }
  0x41   :  { %2300 = vmatprep.subr.msk.mxu0 %vm201_vm1, %v168_v7  ;;  %v331_v34 = vld [vmem:[#allocation6 + $0x68] sm:$0xff]  ;;  %v333_v35 = vld [vmem:[#allocation6 + $0x78] sm:$0xff]  ;;  %v330_v37 = vld [vmem:[#allocation6 + $0x60] sm:$0xff] }
  0x42   :  { %v2353_v36 = vpack.c.bf16 %v333_v35, %v331_v34  ;;  %v332_v38 = vld [vmem:[#allocation6 + $0x70] sm:$0xff]  ;;  %v81_v40 = vld [vmem:[#allocation8 + $0x8] sm:$0xff]  ;;  %v80_v47 = vld [vmem:[#allocation8] sm:$0xff] }
  0x43   :  { %2348 = vmatpush1.bf16.msra.mxu1 %v2347_v22  ;;  %v2355_v39 = vpack.c.bf16 %v332_v38, %v330_v37  ;;  %v85_v41 = vld [vmem:[#allocation8 + $0x28] sm:$0xff]  ;;  %v485_v44 = vld [vmem:[#allocation3] sm:$0xff]  ;;  %v84_v48 = vld [vmem:[#allocation8 + $0x20] sm:$0xff] }
  0x44   :  { %2301 = vmatpush3.msk.msra.mxu0 %vm201_vm1, %v168_v7  ;;  %2350 = vmatprep.subr.bf16.mxu1 %v2349_v24  ;;  %v3380_v42 = vpack.c.bf16 %v85_v41, %v81_v40  ;;  %v3389_v45 = vld [vmem:[%s3990_s4] ss:$0 sm:$0xff]  ;;  %v3392_v53 = vpack.c.bf16 %v84_v48, %v80_v47  ;;  %v88_v58 = vld [vmem:[#allocation8 + $0x40] sm:$0xff] }
  0x45   :  { %2303 = vmatmul.mubr.msk.f32.vlgmr.msra.gmra.mrb[0].mxu0 %vm176_vm0, %v157_v23  ;;  %582 = vrot.lane.b32.xlu0 %v485_v44, %s3226_s12  ;;  %v89_v50 = vld [vmem:[#allocation8 + $0x48] sm:$0xff]  ;;  %v92_v59 = vld [vmem:[#allocation8 + $0x60] sm:$0xff] }
  0x46   :  { %2305 = vmatprep.mubr.msk.f32.mxu0 %vm176_vm0, %v158_v27  ;;  %v93_v51 = vld [vmem:[#allocation8 + $0x68] sm:$0xff]  ;;  %v3401_v0 = vpack.c.bf16 %v92_v59, %v88_v58  ;;  %v96_v3 = vld [vmem:[#allocation8 + $0x80] sm:$0xff]  ;;  %v146_v58 = vlaneseq }
  0x47   :  { %2352 = vmatpush1.bf16.msra.mxu1 %v2351_v28  ;;  %v3395_v57 = vpack.c.bf16 %v93_v51, %v89_v50  ;;  %v97_v61 = vld [vmem:[#allocation8 + $0x88] sm:$0xff]  ;;  %v100_v4 = vld [vmem:[#allocation8 + $0xa0] sm:$0xff] }
  0x48   :  { %2354 = vmatprep.subr.bf16.mxu1 %v2353_v36  ;;  %v101_v62 = vld [vmem:[#allocation8 + $0xa8] sm:$0xff]  ;;  %v3409_v10 = vpack.c.bf16 %v100_v4, %v96_v3  ;;  %v104_v13 = vld [vmem:[#allocation8 + $0xc0] sm:$0xff]  ;;  %v3485_v59 = vshrl.u32 %v146_v58, 7  ;;  %v123_v58 = vld [vmem:[#allocation8 + $0x158] sm:$0xff] }
  0x49   :  { %2306 = vmatmul.mubr.msk.f32.gmra.mrb[2].mxu0 %vm176_vm0, %v159_v29  ;;  %v3404_v2 = vpack.c.bf16 %v101_v62, %v97_v61  ;;  %v105_v7 = vld [vmem:[#allocation8 + $0xc8] sm:$0xff]  ;;  %v108_v14 = vld [vmem:[#allocation8 + $0xe0] sm:$0xff] }
  0x4a   :  { %2308 = vmatprep.mubr.msk.f32.mxu0 %vm176_vm0, %v160_v30  ;;  %v109_v8 = vld [vmem:[#allocation8 + $0xe8] sm:$0xff]  ;;  %v3419_v20 = vpack.c.bf16 %v108_v14, %v104_v13  ;;  %v112_v23 = vld [vmem:[#allocation8 + $0x100] sm:$0xff] }
  0x4b   :  { %2356 = vmatpush1.bf16.msra.mxu1 %v2355_v39  ;;  %v3413_v12 = vpack.c.bf16 %v109_v8, %v105_v7  ;;  %v113_v16 = vld [vmem:[#allocation8 + $0x108] sm:$0xff]  ;;  %v116_v24 = vld [vmem:[#allocation8 + $0x120] sm:$0xff] }
  0x4c   :  { %2358 = vmatprep.subr.bf16.mxu1 %v3380_v42  ;;  %v117_v17 = vld [vmem:[#allocation8 + $0x128] sm:$0xff]  ;;  %v3427_v28 = vpack.c.bf16 %v116_v24, %v112_v23  ;;  %v128_v39 = vld [vmem:[#allocation8 + $0x180] sm:$0xff]  ;;  %v95_v23 = vld [vmem:[#allocation8 + $0x78] sm:$0xff] }
  0x4d   :  { %2309 = vmatmul.mubr.msk.f32.gmra.mrb[4].mxu0 %vm176_vm0, %v161_v31  ;;  %v3422_v22 = vpack.c.bf16 %v117_v17, %v113_v16  ;;  %v121_v25 = vld [vmem:[#allocation8 + $0x148] sm:$0xff]  ;;  %v120_v31 = vld [vmem:[#allocation8 + $0x140] sm:$0xff]  ;;  %v87_v16 = vld [vmem:[#allocation8 + $0x38] sm:$0xff] }
  0x4e   :  { %2311 = vmatprep.mubr.msk.f32.mxu0 %vm176_vm0, %v162_v32  ;;  %v125_v26 = vld [vmem:[#allocation8 + $0x168] sm:$0xff]  ;;  %v124_v32 = vld [vmem:[#allocation8 + $0x160] sm:$0xff]  ;;  %v82_v17 = vld [vmem:[#allocation8 + $0x10] sm:$0xff] }
  0x4f   :  { %v3431_v30 = vpack.c.bf16 %v125_v26, %v121_v25  ;;  %v133_v34 = vld [vmem:[#allocation8 + $0x1a8] sm:$0xff]  ;;  %v3437_v36 = vpack.c.bf16 %v124_v32, %v120_v31  ;;  %v132_v40 = vld [vmem:[#allocation8 + $0x1a0] sm:$0xff]  ;;  %v90_v26 = vld [vmem:[#allocation8 + $0x50] sm:$0xff] }
  0x50   :  { %v137_v41 = vld [vmem:[#allocation8 + $0x1c8] sm:$0xff]  ;;  %v3445_v47 = vpack.c.bf16 %v132_v40, %v128_v39  ;;  %v136_v50 = vld [vmem:[#allocation8 + $0x1c0] sm:$0xff]  ;;  %v103_v31 = vld [vmem:[#allocation8 + $0xb8] sm:$0xff] }
  0x51   :  { %2312 = vmatmul.mubr.msk.f32.gmra.mrb[6].mxu0 %vm176_vm0, %v163_v33  ;;  %v129_v33 = vld [vmem:[#allocation8 + $0x188] sm:$0xff]  ;;  %v140_v51 = vld [vmem:[#allocation8 + $0x1e0] sm:$0xff]  ;;  %v111_v39 = vld [vmem:[#allocation8 + $0xf8] sm:$0xff] }
  0x52   :  { %734 = vmatprep.mubr.f32.mxu0 %v3227_v43  ;;  %v3440_v38 = vpack.c.bf16 %v133_v34, %v129_v33  ;;  %v141_v44 = vld [vmem:[#allocation8 + $0x1e8] sm:$0xff]  ;;  %v98_v34 = vld [vmem:[#allocation8 + $0x90] sm:$0xff] }
  0x53   :  { %v334_v61 = vld [vmem:[%s3992_s6] sm:$0x3] }
 0x118   :  { %v2304_v46 = vpop.f32.mrb[0].mxu0 }
 0x119   :  { %v271_v49 = vpop.f32.mrb[1].mxu0  ;;  %v277_v54 = vadd.f32 %v2304_v46, %v3389_v45 }
 0x11a   :  { %v272_v52 = vadd.f32 %v3389_v45, %v271_v49  ;;  %v3449_v49 = vpack.c.bf16 %v141_v44, %v137_v41  ;;  %v106_v44 = vld [vmem:[#allocation8 + $0xd0] sm:$0xff] }
 0x11b   :  { %v311_v1 = vmax.f32 %v277_v54, 0.0 }
 0x11c   :  { %v310_v55 = vmax.f32 %v272_v52, 0.0  ;;  %v2307_v56 = vpop.f32.mrb[2].mxu0  ;;  %v3454_v52 = vpack.c.bf16 %v140_v51, %v136_v50  ;;  %v119_v50 = vld [vmem:[#allocation8 + $0x138] sm:$0xff] }
 0x11d   :  { %v281_v60 = vpop.f32.mrb[3].mxu0  ;;  %v287_v11 = vadd.f32 %v2307_v56, %v3389_v45 }
 0x11e   :  { %2226 = vmatmul.mubr.msk.f32.vlgmr.msra.gmra.mrb[0].mxu1 %vm346_vm2, %v310_v55  ;;  %v282_v63 = vadd.f32 %v3389_v45, %v281_v60  ;;  %v3457_v55 = vpop.permute.xlu0 %491  ;;  %v148_v60 = vsub.s32 0, %v3485_v59 }
 0x11f   :  { %2360 = vmatpush1.bf16.msra.mxu1 %v3392_v53  ;;  %441 = vmatprep.mubr.f32.mxu1 %v3227_v43  ;;  %v313_v21 = vmax.f32 %v287_v11, 0.0 }
 0x120   :  { %2362 = vmatprep.subr.bf16.mxu1 %v3395_v57  ;;  %v2310_v5 = vpop.f32.mrb[4].mxu0  ;;  %v312_v9 = vmax.f32 %v282_v63, 0.0  ;;  %v3493_v62 = vrot.slane %v334_v61, %v148_v60 }
 0x121   :  { %v291_v6 = vpop.f32.mrb[5].mxu0  ;;  %v297_v29 = vadd.f32 %v2310_v5, %v3389_v45  ;;  %v152_v5 = vsub.s32 1, %v3485_v59 }
 0x122   :  { %2227 = vmatmul.mubr.msk.f32.gmra.mrb[2].mxu1 %vm346_vm2, %v311_v1  ;;  %v292_v19 = vadd.f32 %v3389_v45, %v291_v6 }
 0x123   :  { %2364 = vmatpush1.bf16.msra.mxu1 %v3401_v0  ;;  %447 = vmatprep.mubr.f32.mxu1 %v3227_v43  ;;  %v315_v37 = vmax.f32 %v297_v29, 0.0  ;;  %v3499_v6 = vrot.slane %v334_v61, %v152_v5  ;;  %v99_v29 = vld [vmem:[#allocation8 + $0x98] sm:$0xff] }
 0x124   :  { %2366 = vmatprep.subr.bf16.mxu1 %v3404_v2  ;;  %v2313_v15 = vpop.f32.mrb[6].mxu0  ;;  %v314_v27 = vmax.f32 %v292_v19, 0.0  ;;  %v86_v19 = vld [vmem:[#allocation8 + $0x30] sm:$0xff]  ;;  %v3520_v33 = vpack.c.bf16 %v103_v31, %v99_v29  ;;  %v127_v61 = vld [vmem:[#allocation8 + $0x178] sm:$0xff] }
 0x125   :  { %v301_v18 = vpop.f32.mrb[7].mxu0  ;;  %v307_v48 = vadd.f32 %v2313_v15, %v3389_v45  ;;  %v83_v15 = vld [vmem:[#allocation8 + $0x18] sm:$0xff]  ;;  %v3511_v24 = vpack.c.bf16 %v86_v19, %v82_v17 }
 0x126   :  { %2228 = vmatmul.mubr.msk.f32.gmra.mrb[4].mxu1 %vm346_vm2, %v312_v9  ;;  %v302_v35 = vadd.f32 %v3389_v45, %v301_v18  ;;  %v484_v45 = vld [vmem:[%s3987_s1] sm:$0xff]  ;;  %v3509_v18 = vpack.c.bf16 %v87_v16, %v83_v15  ;;  %v130_v15 = vld [vmem:[#allocation8 + $0x190] sm:$0xff]  ;;  %v139_v17 = vld [vmem:[#allocation8 + $0x1d8] sm:$0xff] }
 0x127   :  { %2368 = vmatpush1.bf16.msra.mxu1 %v3409_v10  ;;  %453 = vmatprep.mubr.f32.mxu1 %v3227_v43  ;;  %v317_v54 = vmax.f32 %v307_v48, 0.0  ;;  %v494_v56 = vsel %vm346_vm2, %v484_v45, %v3457_v55  ;;  %v115_v48 = vld [vmem:[#allocation8 + $0x118] sm:$0xff]  ;;  %v114_v45 = vld [vmem:[#allocation8 + $0x110] sm:$0xff] }
 0x128   :  { %2370 = vmatprep.subr.bf16.mxu1 %v3413_v12  ;;  %v316_v46 = vmax.f32 %v302_v35, 0.0  ;;  %2422 = vmatprep.subr.bf16.mxu0 %v3509_v18  ;;  %v102_v35 = vld [vmem:[#allocation8 + $0xb0] sm:$0xff]  ;;  %v143_v19 = vld [vmem:[#allocation8 + $0x1f8] sm:$0xff] }
 0x129   :  { %2424 = vmatpush1.bf16.msra.mxu0 %v3511_v24  ;;  %v3523_v40 = vpack.c.bf16 %v102_v35, %v98_v34  ;;  %v134_v16 = vld [vmem:[#allocation8 + $0x1b0] sm:$0xff]  ;;  %v583_v35 = vpop.permute.xlu0 %582 }
 0x12a   :  { %2229 = vmatmul.mubr.msk.f32.gmra.mrb[6].mxu1 %vm346_vm2, %v313_v21  ;;  %v91_v21 = vld [vmem:[#allocation8 + $0x58] sm:$0xff] }
 0x12b   :  { %2372 = vmatpush1.bf16.msra.mxu1 %v3419_v20  ;;  %459 = vmatprep.mubr.f32.mxu1 %v3227_v43  ;;  %v3513_v25 = vpack.c.bf16 %v95_v23, %v91_v21  ;;  %v3547_v21 = vpack.c.bf16 %v134_v16, %v130_v15  ;;  %v3550_v23 = vpack.c.bf16 %v143_v19, %v139_v17 }
 0x12c   :  { %2374 = vmatprep.subr.bf16.mxu1 %v3422_v22 }
 0x12d   :  { %2426 = vmatprep.subr.bf16.mxu0 %v3513_v25 }
 0x12e   :  { %2230 = vmatmul.mubr.msk.f32.gmra.mrb[8].mxu1 %vm346_vm2, %v314_v27  ;;  %v94_v27 = vld [vmem:[#allocation8 + $0x70] sm:$0xff] }
 0x12f   :  { %2376 = vmatpush1.bf16.msra.mxu1 %v3427_v28  ;;  %465 = vmatprep.mubr.f32.mxu1 %v3227_v43  ;;  %v3517_v32 = vpack.c.bf16 %v94_v27, %v90_v26  ;;  %v138_v26 = vld [vmem:[#allocation8 + $0x1d0] sm:$0xff] }
 0x130   :  { %2378 = vmatprep.subr.bf16.mxu1 %v3431_v30  ;;  %v142_v27 = vld [vmem:[#allocation8 + $0x1f0] sm:$0xff] }
 0x131   :  { %2428 = vmatpush1.bf16.msra.mxu0 %v3517_v32  ;;  %v3553_v29 = vpack.c.bf16 %v142_v27, %v138_v26 }
 0x132   :  { %2231 = vmatmul.mubr.msk.f32.gmra.mrb[10].mxu1 %vm346_vm2, %v315_v37  ;;  %v107_v37 = vld [vmem:[#allocation8 + $0xd8] sm:$0xff]  ;;  %2430 = vmatprep.subr.bf16.mxu0 %v3520_v33 }
 0x133   :  { %2380 = vmatpush1.bf16.msra.mxu1 %v3437_v36  ;;  %471 = vmatprep.mubr.f32.mxu1 %v3227_v43  ;;  %v3526_v41 = vpack.c.bf16 %v111_v39, %v107_v37 }
 0x134   :  { %2382 = vmatprep.subr.bf16.mxu1 %v3440_v38 }
 0x135   :  { %2432 = vmatpush1.bf16.msra.mxu0 %v3523_v40 }
 0x136   :  { %2232 = vmatmul.mubr.msk.f32.gmra.mrb[12].mxu1 %vm346_vm2, %v316_v46  ;;  %v110_v46 = vld [vmem:[#allocation8 + $0xf0] sm:$0xff]  ;;  %2434 = vmatprep.subr.bf16.mxu0 %v3526_v41 }
 0x137   :  { %2384 = vmatpush1.bf16.msra.mxu1 %v3445_v47  ;;  %477 = vmatprep.mubr.f32.mxu1 %v3227_v43  ;;  %v3529_v51 = vpack.c.bf16 %v110_v46, %v106_v44 }
 0x138   :  { %2386 = vmatprep.subr.bf16.mxu1 %v3449_v49 }
 0x139   :  { %2436 = vmatpush1.bf16.msra.mxu0 %v3529_v51 }
 0x13a   :  { %2233 = vmatmul.mubr.msk.f32.gmra.mrb[14].mxu1 %vm346_vm2, %v317_v54  ;;  %v3532_v54 = vpack.c.bf16 %v119_v50, %v115_v48 }
 0x13b   :  { %2388 = vmatpush1.bf16.msra.mxu1 %v3454_v52  ;;  %559 = vmatprep.mubr.f32.mxu1 %v3227_v43 }
 0x13c   :  { %2390 = vmatprep.subr.bf16.mxu1 %v3380_v42  ;;  %2438 = vmatprep.subr.bf16.mxu0 %v3532_v54 }
 0x13e   :  { %560 = vmatmul.mubr.f32.vlgmr.msra.gmra.mrb[0].mxu1 %v494_v56  ;;  %v118_v56 = vld [vmem:[#allocation8 + $0x130] sm:$0xff] }
 0x13f   :  { %2392 = vmatpush1.bf16.msra.mxu1 %v3392_v53  ;;  %663 = vmatprep.mubr.f32.mxu1 %v3227_v43 }
 0x140   :  { %2394 = vmatprep.subr.bf16.mxu1 %v3395_v57 }
 0x143   :  { %2396 = vmatpush1.bf16.msra.mxu1 %v3401_v0 }
 0x144   :  { %2398 = vmatprep.subr.bf16.mxu1 %v3404_v2 }
 0x147   :  { %2400 = vmatpush1.bf16.msra.mxu1 %v3409_v10 }
 0x148   :  { %2402 = vmatprep.subr.bf16.mxu1 %v3413_v12 }
 0x14b   :  { %2404 = vmatpush1.bf16.msra.mxu1 %v3419_v20 }
 0x14c   :  { %2406 = vmatprep.subr.bf16.mxu1 %v3422_v22 }
 0x14f   :  { %2408 = vmatpush1.bf16.msra.mxu1 %v3427_v28 }
 0x150   :  { %2410 = vmatprep.subr.bf16.mxu1 %v3431_v30 }
 0x153   :  { %2412 = vmatpush1.bf16.msra.mxu1 %v3437_v36 }
 0x154   :  { %2414 = vmatprep.subr.bf16.mxu1 %v3440_v38 }
 0x157   :  { %2416 = vmatpush1.bf16.msra.mxu1 %v3445_v47 }
 0x158   :  { %2418 = vmatprep.subr.bf16.mxu1 %v3449_v49 }
 0x15b   :  { %2420 = vmatpush1.bf16.msra.mxu1 %v3454_v52 }
 0x15c   :  { %2454 = vmatprep.subr.bf16.mxu1 %v3380_v42 }
 0x211   :  { %v561_v63 = vpop.f32.mrb[0].mxu1 }
 0x212   :  { %v2881_v1 = vadd.f32 %v561_v63, %v3493_v62  ;;  %v563_v3 = vpop.f32.mrb[1].mxu1  ;;  %v3535_v63 = vpack.c.bf16 %v118_v56, %v114_v45  ;;  %v489_v56 = vld [vmem:[#allocation3 + $0x8] sm:$0xff] }
 0x213   :  { %v3502_v7 = vadd.f32 %v563_v3, %v3499_v6  ;;  %v122_v3 = vld [vmem:[#allocation8 + $0x150] sm:$0xff] }
 0x214   :  { %v2235_v4 = vmul.f32 -1.442695, %v2881_v1  ;;  %v3538_v1 = vpack.c.bf16 %v127_v61, %v123_v58  ;;  %2440 = vmatpush1.bf16.msra.mxu0 %v3535_v63 }
 0x215   :  { %v2236_v31 = vmul.f32 -1.442695, %v3502_v7 }
 0x216   :  { %2927 = vpow2.f32 %v2235_v4  ;;  %v126_v4 = vld [vmem:[#allocation8 + $0x170] sm:$0xff]  ;;  %2442 = vmatprep.subr.bf16.mxu0 %v3538_v1 }
 0x217   :  { %2929 = vtanh.f32 %v3502_v7 }
 0x220   :  { %v2928_v8 = vpop.eup %2927 }
 0x221   :  { %v574_v9 = vadd.f32 1.0, %v2928_v8  ;;  %v2930_v11 = vpop.eup %2929  ;;  %v131_v8 = vld [vmem:[#allocation8 + $0x198] sm:$0xff] }
 0x223   :  { %2931 = vrcp.f32 %v574_v9  ;;  %v135_v9 = vld [vmem:[#allocation8 + $0x1b8] sm:$0xff] }
 0x224   :  { %2933 = vpow2.f32 %v2236_v31 }
 0x22d   :  { %v3505_v13 = vpop.eup %2931 }
 0x22e   :  { %v586_v14 = vmul.f32 %v3505_v13, %v2930_v11  ;;  %v3541_v11 = vpack.c.bf16 %v126_v4, %v122_v3  ;;  %v2934_v34 = vpop.eup %2933  ;;  %v585_v39 = vmul.f32 %v3505_v13, %v583_v35 }
 0x22f   :  { %v575_v37 = vadd.f32 1.0, %v2934_v34 }
 0x230   :  { %588 = vrot.lane.b32.xlu1 %v586_v14, %s3226_s12  ;;  %v3544_v14 = vpack.c.bf16 %v135_v9, %v131_v8  ;;  %2444 = vmatpush1.bf16.msra.mxu0 %v3541_v11 }
 0x231   :  { %2935 = vrcp.f32 %v575_v37 }
 0x232   :  { %2446 = vmatprep.subr.bf16.mxu0 %v3544_v14 }
 0x234   :  { %2448 = vmatpush1.bf16.msra.mxu0 %v3547_v21 }
 0x235   :  { %2450 = vmatprep.subr.bf16.mxu0 %v3550_v23 }
 0x238   :  { %2452 = vmatpush1.bf16.msra.mxu0 %v3553_v29 }
 0x239   :  { %2486 = vmatprep.subr.bf16.mxu0 %v3509_v18 }
 0x23b   :  { %v2936_v48 = vpop.eup %2935 }
 0x2a2   :  { %v589_v44 = vpop.permute.xlu1 %588 }
 0x2a3   :  { %v3560_v46 = vadd.f32 %v589_v44, %v585_v39 }
 0x2a5   :  { %2937 = vtanh.f32 %v3560_v46 }
 0x2af   :  { %v2938_v50 = vpop.eup %2937 }
 0x2b0   :  { %v593_v45 = vmul.f32 %v2938_v50, %v2936_v48 }
 0x2b2   :  { %595 = vrot.lane.b32.xlu1 %v593_v45, %s3226_s12 }
 0x2b6   :  { %781 = vrot.lane.b32.xlu1 %v489_v56, %s3226_s12 }
 0x324   :  { %v596_v7 = vpop.permute.xlu1 %595 }
 0x325   :  { %v598_v58 = vsel %vm346_vm2, %v596_v7, %v3457_v55  ;;  %v144_v55 = vld [vmem:[%s3994_s8] sm:$0x3] }
 0x326   :  { %664 = vmatmul.mubr.f32.vlgmr.msra.gmra.mrb[2].mxu1 %v598_v58  ;;  %735 = vmatmul.mubr.f32.vlgmr.msra.gmra.mrb[8].mxu0 %v598_v58  ;;  %v3606_v13 = vrot.slane %v144_v55, %v148_v60  ;;  %v3612_v19 = vrot.slane %v144_v55, %v152_v5 }
 0x327   :  { %2456 = vmatpush1.bf16.msra.mxu1 %v3392_v53  ;;  %2488 = vmatpush1.bf16.msra.mxu0 %v3511_v24 }
 0x328   :  { %2458 = vmatprep.subr.bf16.mxu1 %v3395_v57  ;;  %2490 = vmatprep.subr.bf16.mxu0 %v3513_v25 }
 0x329   :  { %868 = vmatprep.mubr.f32.mxu1 %v3227_v43  ;;  %939 = vmatprep.mubr.f32.mxu0 %v3227_v43 }
 0x32b   :  { %2460 = vmatpush1.bf16.msra.mxu1 %v3401_v0  ;;  %2492 = vmatpush1.bf16.msra.mxu0 %v3517_v32 }
 0x32c   :  { %2462 = vmatprep.subr.bf16.mxu1 %v3404_v2  ;;  %2494 = vmatprep.subr.bf16.mxu0 %v3520_v33 }
 0x32f   :  { %2464 = vmatpush1.bf16.msra.mxu1 %v3409_v10  ;;  %2496 = vmatpush1.bf16.msra.mxu0 %v3523_v40 }
 0x330   :  { %2466 = vmatprep.subr.bf16.mxu1 %v3413_v12  ;;  %2498 = vmatprep.subr.bf16.mxu0 %v3526_v41 }
 0x333   :  { %2468 = vmatpush1.bf16.msra.mxu1 %v3419_v20  ;;  %2500 = vmatpush1.bf16.msra.mxu0 %v3529_v51 }
 0x334   :  { %2470 = vmatprep.subr.bf16.mxu1 %v3422_v22  ;;  %2502 = vmatprep.subr.bf16.mxu0 %v3532_v54 }
 0x337   :  { %2472 = vmatpush1.bf16.msra.mxu1 %v3427_v28  ;;  %2504 = vmatpush1.bf16.msra.mxu0 %v3535_v63 }
 0x338   :  { %2474 = vmatprep.subr.bf16.mxu1 %v3431_v30  ;;  %2506 = vmatprep.subr.bf16.mxu0 %v3538_v1 }
 0x33b   :  { %2476 = vmatpush1.bf16.msra.mxu1 %v3437_v36  ;;  %2508 = vmatpush1.bf16.msra.mxu0 %v3541_v11 }
 0x33c   :  { %2478 = vmatprep.subr.bf16.mxu1 %v3440_v38  ;;  %2510 = vmatprep.subr.bf16.mxu0 %v3544_v14 }
 0x33f   :  { %2480 = vmatpush1.bf16.msra.mxu1 %v3445_v47  ;;  %2512 = vmatpush1.bf16.msra.mxu0 %v3547_v21 }
 0x340   :  { %2482 = vmatprep.subr.bf16.mxu1 %v3449_v49  ;;  %2514 = vmatprep.subr.bf16.mxu0 %v3550_v23 }
 0x343   :  { %2484 = vmatpush1.bf16.msra.mxu1 %v3454_v52  ;;  %2516 = vmatpush1.bf16.msra.mxu0 %v3553_v29 }
 0x344   :  { %2518 = vmatprep.subr.bf16.mxu1 %v3380_v42  ;;  %2550 = vmatprep.subr.bf16.mxu0 %v3509_v18 }
 0x3f9   :  { %v665_v61 = vpop.f32.mrb[2].mxu1  ;;  %v736_v3 = vpop.f32.mrb[8].mxu0 }
 0x3fa   :  { %v2883_v4 = vadd.f32 %v665_v61, %v3493_v62  ;;  %v765_v8 = vadd.f32 %v736_v3, %v3606_v13  ;;  %v667_v9 = vpop.f32.mrb[3].mxu1  ;;  %v738_v15 = vpop.f32.mrb[9].mxu0 }
 0x3fb   :  { %v2884_v26 = vadd.f32 %v667_v9, %v3499_v6  ;;  %v766_v60 = vadd.f32 %v738_v15, %v3612_v19  ;;  %v782_v9 = vpop.permute.xlu1 %781 }
 0x3fc   :  { %v2237_v16 = vmul.f32 -1.442695, %v2883_v4  ;;  %v2239_v17 = vmul.f32 -1.442695, %v765_v8 }
 0x3fd   :  { %v2238_v5 = vmul.f32 -1.442695, %v2884_v26  ;;  %v2240_v8 = vmul.f32 -1.442695, %v766_v60 }
 0x3fe   :  { %2939 = vpow2.f32 %v2237_v16 }
 0x3ff   :  { %2941 = vpow2.f32 %v2239_v17 }
 0x400   :  { %2943 = vtanh.f32 %v2884_v26 }
 0x401   :  { %2945 = vtanh.f32 %v766_v60 }
 0x408   :  { %v2940_v27 = vpop.eup %2939 }
 0x409   :  { %v2942_v31 = vpop.eup %2941  ;;  %v749_v34 = vadd.f32 1.0, %v2940_v27 }
 0x40a   :  { %v773_v35 = vadd.f32 1.0, %v2942_v31  ;;  %v2944_v37 = vpop.eup %2943 }
 0x40b   :  { %2947 = vrcp.f32 %v749_v34  ;;  %v2946_v39 = vpop.eup %2945 }
 0x40c   :  { %2949 = vrcp.f32 %v773_v35 }
 0x40d   :  { %2951 = vpow2.f32 %v2238_v5 }
 0x415   :  { %v2948_v44 = vpop.eup %2947 }
 0x416   :  { %v2950_v48 = vpop.eup %2949  ;;  %v757_v50 = vmul.f32 %v2948_v44, %v2944_v37  ;;  %v756_v7 = vmul.f32 %v2948_v44, %v3560_v46 }
 0x417   :  { %v785_v59 = vmul.f32 %v2950_v48, %v2946_v39  ;;  %v2952_v45 = vpop.eup %2951  ;;  %v784_v16 = vmul.f32 %v2950_v48, %v782_v9 }
 0x418   :  { %759 = vrot.lane.b32.xlu0 %v757_v50, %s3226_s12  ;;  %v750_v56 = vadd.f32 1.0, %v2952_v45 }
 0x41a   :  { %2953 = vrcp.f32 %v750_v56 }
 0x41c   :  { %787 = vrot.lane.b32.xlu0 %v785_v59, %s3226_s12 }
 0x424   :  { %v2954_v61 = vpop.eup %2953 }
 0x48a   :  { %v760_v58 = vpop.permute.xlu0 %759 }
 0x48b   :  { %v3619_v55 = vadd.f32 %v760_v58, %v756_v7 }
 0x48d   :  { %2955 = vtanh.f32 %v3619_v55 }
 0x48e   :  { %2957 = vpow2.f32 %v2240_v8  ;;  %v788_v15 = vpop.permute.xlu0 %787 }
 0x48f   :  { %v3623_v26 = vadd.f32 %v788_v15, %v784_v16 }
 0x491   :  { %2959 = vtanh.f32 %v3623_v26 }
 0x497   :  { %v2956_v3 = vpop.eup %2955 }
 0x498   :  { %v764_v4 = vmul.f32 %v2956_v3, %v2954_v61  ;;  %v2958_v17 = vpop.eup %2957 }
 0x499   :  { %v774_v46 = vadd.f32 1.0, %v2958_v17 }
 0x49a   :  { %800 = vrot.lane.b32.xlu1 %v764_v4, %s3226_s12 }
 0x49b   :  { %2961 = vrcp.f32 %v774_v46  ;;  %v2960_v27 = vpop.eup %2959 }
 0x4a5   :  { %v2962_v31 = vpop.eup %2961 }
 0x4a6   :  { %v3626_v34 = vmul.f32 %v2962_v31, %v2960_v27 }
 0x50c   :  { %v801_v35 = vpop.permute.xlu1 %800 }
 0x50d   :  { %v803_v37 = vsel %vm346_vm2, %v801_v35, %v3626_v34 }
 0x50e   :  { %869 = vmatmul.mubr.f32.vlgmr.msra.gmra.mrb[4].mxu1 %v803_v37  ;;  %940 = vmatmul.mubr.f32.vlgmr.msra.gmra.mrb[10].mxu0 %v803_v37 }
 0x50f   :  { %2520 = vmatpush1.bf16.msra.mxu1 %v3392_v53  ;;  %2552 = vmatpush1.bf16.msra.mxu0 %v3511_v24 }
 0x510   :  { %2522 = vmatprep.subr.bf16.mxu1 %v3395_v57  ;;  %2554 = vmatprep.subr.bf16.mxu0 %v3513_v25 }
 0x511   :  { %1068 = vmatprep.mubr.f32.mxu1 %v3227_v43  ;;  %1139 = vmatprep.mubr.f32.mxu0 %v3227_v43 }
 0x513   :  { %2524 = vmatpush1.bf16.msra.mxu1 %v3401_v0  ;;  %2556 = vmatpush1.bf16.msra.mxu0 %v3517_v32 }
 0x514   :  { %2526 = vmatprep.subr.bf16.mxu1 %v3404_v2  ;;  %2558 = vmatprep.subr.bf16.mxu0 %v3520_v33 }
 0x517   :  { %2528 = vmatpush1.bf16.msra.mxu1 %v3409_v10  ;;  %2560 = vmatpush1.bf16.msra.mxu0 %v3523_v40 }
 0x518   :  { %2530 = vmatprep.subr.bf16.mxu1 %v3413_v12  ;;  %2562 = vmatprep.subr.bf16.mxu0 %v3526_v41 }
 0x51b   :  { %2532 = vmatpush1.bf16.msra.mxu1 %v3419_v20  ;;  %2564 = vmatpush1.bf16.msra.mxu0 %v3529_v51 }
 0x51c   :  { %2534 = vmatprep.subr.bf16.mxu1 %v3422_v22  ;;  %2566 = vmatprep.subr.bf16.mxu0 %v3532_v54 }
 0x51f   :  { %2536 = vmatpush1.bf16.msra.mxu1 %v3427_v28  ;;  %2568 = vmatpush1.bf16.msra.mxu0 %v3535_v63 }
 0x520   :  { %2538 = vmatprep.subr.bf16.mxu1 %v3431_v30  ;;  %2570 = vmatprep.subr.bf16.mxu0 %v3538_v1 }
 0x523   :  { %2540 = vmatpush1.bf16.msra.mxu1 %v3437_v36  ;;  %2572 = vmatpush1.bf16.msra.mxu0 %v3541_v11 }
 0x524   :  { %2542 = vmatprep.subr.bf16.mxu1 %v3440_v38  ;;  %2574 = vmatprep.subr.bf16.mxu0 %v3544_v14 }
 0x527   :  { %2544 = vmatpush1.bf16.msra.mxu1 %v3445_v47  ;;  %2576 = vmatpush1.bf16.msra.mxu0 %v3547_v21 }
 0x528   :  { %2546 = vmatprep.subr.bf16.mxu1 %v3449_v49  ;;  %2578 = vmatprep.subr.bf16.mxu0 %v3550_v23 }
 0x52b   :  { %2548 = vmatpush1.bf16.msra.mxu1 %v3454_v52  ;;  %2580 = vmatpush1.bf16.msra.mxu0 %v3553_v29 }
 0x52c   :  { %2582 = vmatprep.subr.bf16.mxu1 %v3380_v42  ;;  %2614 = vmatprep.subr.bf16.mxu0 %v3509_v18 }
 0x5e1   :  { %v870_v60 = vpop.f32.mrb[4].mxu1  ;;  %v941_v39 = vpop.f32.mrb[10].mxu0 }
 0x5e2   :  { %v2885_v44 = vadd.f32 %v870_v60, %v3493_v62  ;;  %v970_v48 = vadd.f32 %v941_v39, %v3606_v13  ;;  %v872_v50 = vpop.f32.mrb[5].mxu1  ;;  %v943_v59 = vpop.f32.mrb[11].mxu0 }
 0x5e3   :  { %v2886_v56 = vadd.f32 %v872_v50, %v3499_v6  ;;  %v971_v7 = vadd.f32 %v943_v59, %v3612_v19 }
 0x5e4   :  { %v2241_v5 = vmul.f32 -1.442695, %v2885_v44  ;;  %v2243_v45 = vmul.f32 -1.442695, %v970_v48 }
 0x5e5   :  { %v2242_v27 = vmul.f32 -1.442695, %v2886_v56  ;;  %v2244_v59 = vmul.f32 -1.442695, %v971_v7 }
 0x5e6   :  { %2963 = vpow2.f32 %v2241_v5 }
 0x5e7   :  { %2965 = vpow2.f32 %v2243_v45 }
 0x5e8   :  { %2967 = vtanh.f32 %v2886_v56 }
 0x5e9   :  { %2969 = vtanh.f32 %v971_v7 }
 0x5f0   :  { %v2964_v58 = vpop.eup %2963 }
 0x5f1   :  { %v2966_v61 = vpop.eup %2965  ;;  %v954_v3 = vadd.f32 1.0, %v2964_v58 }
 0x5f2   :  { %v978_v4 = vadd.f32 1.0, %v2966_v61  ;;  %v2968_v8 = vpop.eup %2967 }
 0x5f3   :  { %2971 = vrcp.f32 %v954_v3  ;;  %v2970_v9 = vpop.eup %2969 }
 0x5f4   :  { %2973 = vrcp.f32 %v978_v4 }
 0x5f5   :  { %2975 = vpow2.f32 %v2242_v27 }
 0x5fd   :  { %v2972_v15 = vpop.eup %2971 }
 0x5fe   :  { %v2974_v16 = vpop.eup %2973  ;;  %v962_v17 = vmul.f32 %v2972_v15, %v2968_v8  ;;  %v961_v37 = vmul.f32 %v2972_v15, %v3619_v55 }
 0x5ff   :  { %v986_v46 = vmul.f32 %v2974_v16, %v2970_v9  ;;  %v2976_v31 = vpop.eup %2975  ;;  %v985_v45 = vmul.f32 %v2974_v16, %v3623_v26 }
 0x600   :  { %964 = vrot.lane.b32.xlu0 %v962_v17, %s3226_s12  ;;  %v955_v35 = vadd.f32 1.0, %v2976_v31 }
 0x601   :  { %988 = vrot.lane.b32.xlu1 %v986_v46, %s3226_s12 }
 0x602   :  { %2977 = vrcp.f32 %v955_v35 }
 0x60c   :  { %v2978_v44 = vpop.eup %2977 }
 0x672   :  { %v965_v60 = vpop.permute.xlu0 %964 }
 0x673   :  { %v3671_v39 = vadd.f32 %v965_v60, %v961_v37  ;;  %v989_v5 = vpop.permute.xlu1 %988 }
 0x674   :  { %v3676_v58 = vadd.f32 %v989_v5, %v985_v45 }
 0x675   :  { %2979 = vtanh.f32 %v3671_v39 }
 0x676   :  { %2981 = vpow2.f32 %v2244_v59 }
 0x677   :  { %2983 = vtanh.f32 %v3676_v58 }
 0x67f   :  { %v2980_v48 = vpop.eup %2979 }
 0x680   :  { %v969_v50 = vmul.f32 %v2980_v48, %v2978_v44  ;;  %v2982_v56 = vpop.eup %2981 }
 0x681   :  { %v979_v55 = vadd.f32 1.0, %v2982_v56  ;;  %v2984_v61 = vpop.eup %2983 }
 0x682   :  { %1000 = vrot.lane.b32.xlu0 %v969_v50, %s3226_s12 }
 0x683   :  { %2985 = vrcp.f32 %v979_v55 }
 0x68d   :  { %v2986_v3 = vpop.eup %2985 }
 0x68e   :  { %v3679_v4 = vmul.f32 %v2986_v3, %v2984_v61 }
 0x6f4   :  { %v1001_v8 = vpop.permute.xlu0 %1000 }
 0x6f5   :  { %v1003_v9 = vsel %vm346_vm2, %v1001_v8, %v3679_v4 }
 0x6f6   :  { %1069 = vmatmul.mubr.f32.vlgmr.msra.gmra.mrb[6].mxu1 %v1003_v9  ;;  %1140 = vmatmul.mubr.f32.vlgmr.msra.gmra.mrb[12].mxu0 %v1003_v9 }
 0x6f7   :  { %2584 = vmatpush1.bf16.msra.mxu1 %v3392_v53  ;;  %2616 = vmatpush1.bf16.msra.mxu0 %v3511_v24 }
 0x6f8   :  { %2586 = vmatprep.subr.bf16.mxu1 %v3395_v57  ;;  %2618 = vmatprep.subr.bf16.mxu0 %v3513_v25 }
 0x6f9   :  { %1268 = vmatprep.mubr.f32.mxu1 %v3227_v43  ;;  %1339 = vmatprep.mubr.f32.mxu0 %v3227_v43 }
 0x6fb   :  { %2588 = vmatpush1.bf16.msra.mxu1 %v3401_v0  ;;  %2620 = vmatpush1.bf16.msra.mxu0 %v3517_v32 }
 0x6fc   :  { %2590 = vmatprep.subr.bf16.mxu1 %v3404_v2  ;;  %2622 = vmatprep.subr.bf16.mxu0 %v3520_v33 }
 0x6ff   :  { %2592 = vmatpush1.bf16.msra.mxu1 %v3409_v10  ;;  %2624 = vmatpush1.bf16.msra.mxu0 %v3523_v40 }
 0x700   :  { %2594 = vmatprep.subr.bf16.mxu1 %v3413_v12  ;;  %2626 = vmatprep.subr.bf16.mxu0 %v3526_v41 }
 0x703   :  { %2596 = vmatpush1.bf16.msra.mxu1 %v3419_v20  ;;  %2628 = vmatpush1.bf16.msra.mxu0 %v3529_v51 }
 0x704   :  { %2598 = vmatprep.subr.bf16.mxu1 %v3422_v22  ;;  %2630 = vmatprep.subr.bf16.mxu0 %v3532_v54 }
 0x707   :  { %2600 = vmatpush1.bf16.msra.mxu1 %v3427_v28  ;;  %2632 = vmatpush1.bf16.msra.mxu0 %v3535_v63 }
 0x708   :  { %2602 = vmatprep.subr.bf16.mxu1 %v3431_v30  ;;  %2634 = vmatprep.subr.bf16.mxu0 %v3538_v1 }
 0x70b   :  { %2604 = vmatpush1.bf16.msra.mxu1 %v3437_v36  ;;  %2636 = vmatpush1.bf16.msra.mxu0 %v3541_v11 }
 0x70c   :  { %2606 = vmatprep.subr.bf16.mxu1 %v3440_v38  ;;  %2638 = vmatprep.subr.bf16.mxu0 %v3544_v14 }
 0x70f   :  { %2608 = vmatpush1.bf16.msra.mxu1 %v3445_v47  ;;  %2640 = vmatpush1.bf16.msra.mxu0 %v3547_v21 }
 0x710   :  { %2610 = vmatprep.subr.bf16.mxu1 %v3449_v49  ;;  %2642 = vmatprep.subr.bf16.mxu0 %v3550_v23 }
 0x713   :  { %2612 = vmatpush1.bf16.msra.mxu1 %v3454_v52  ;;  %2644 = vmatpush1.bf16.msra.mxu0 %v3553_v29 }
 0x714   :  { %2646 = vmatprep.subr.bf16.mxu1 %v3380_v42  ;;  %2678 = vmatprep.subr.bf16.mxu0 %v3509_v18 }
 0x7c9   :  { %v1070_v26 = vpop.f32.mrb[6].mxu1  ;;  %v1141_v7 = vpop.f32.mrb[12].mxu0 }
 0x7ca   :  { %v2887_v15 = vadd.f32 %v1070_v26, %v3493_v62  ;;  %v1170_v16 = vadd.f32 %v1141_v7, %v3606_v13  ;;  %v1072_v17 = vpop.f32.mrb[7].mxu1  ;;  %v1143_v46 = vpop.f32.mrb[13].mxu0 }
 0x7cb   :  { %v2888_v35 = vadd.f32 %v1072_v17, %v3499_v6  ;;  %v1171_v37 = vadd.f32 %v1143_v46, %v3612_v19 }
 0x7cc   :  { %v2245_v27 = vmul.f32 -1.442695, %v2887_v15  ;;  %v2247_v31 = vmul.f32 -1.442695, %v1170_v16 }
 0x7cd   :  { %v2246_v3 = vmul.f32 -1.442695, %v2888_v35 }
 0x7ce   :  { %2987 = vpow2.f32 %v2245_v27  ;;  %v2248_v27 = vmul.f32 -1.442695, %v1171_v37 }
 0x7cf   :  { %2989 = vpow2.f32 %v2247_v31 }
 0x7d0   :  { %2991 = vtanh.f32 %v2888_v35 }
 0x7d1   :  { %2993 = vtanh.f32 %v1171_v37 }
 0x7d8   :  { %v2988_v60 = vpop.eup %2987 }
 0x7d9   :  { %v2990_v44 = vpop.eup %2989  ;;  %v1154_v48 = vadd.f32 1.0, %v2988_v60 }
 0x7da   :  { %v1178_v50 = vadd.f32 1.0, %v2990_v44  ;;  %v2992_v59 = vpop.eup %2991 }
 0x7db   :  { %2995 = vrcp.f32 %v1154_v48  ;;  %v2994_v5 = vpop.eup %2993 }
 0x7dc   :  { %2997 = vrcp.f32 %v1178_v50 }
 0x7dd   :  { %2999 = vpow2.f32 %v2246_v3 }
 0x7e5   :  { %v2996_v45 = vpop.eup %2995 }
 0x7e6   :  { %v2998_v56 = vpop.eup %2997  ;;  %v1162_v55 = vmul.f32 %v2996_v45, %v2992_v59  ;;  %v1161_v26 = vmul.f32 %v2996_v45, %v3671_v39 }
 0x7e7   :  { %v1186_v61 = vmul.f32 %v2998_v56, %v2994_v5  ;;  %v3000_v8 = vpop.eup %2999  ;;  %v1185_v35 = vmul.f32 %v2998_v56, %v3676_v58 }
 0x7e8   :  { %1164 = vrot.lane.b32.xlu1 %v1162_v55, %s3226_s12  ;;  %v1155_v9 = vadd.f32 1.0, %v3000_v8 }
 0x7e9   :  { %1188 = vrot.lane.b32.xlu0 %v1186_v61, %s3226_s12 }
 0x7ea   :  { %3001 = vrcp.f32 %v1155_v9 }
 0x7f4   :  { %v3002_v16 = vpop.eup %3001 }
 0x85a   :  { %v1165_v7 = vpop.permute.xlu1 %1164 }
 0x85b   :  { %v3724_v15 = vadd.f32 %v1165_v7, %v1161_v26  ;;  %v1189_v31 = vpop.permute.xlu0 %1188 }
 0x85c   :  { %v3729_v44 = vadd.f32 %v1189_v31, %v1185_v35 }
 0x85d   :  { %3003 = vtanh.f32 %v3724_v15 }
 0x85e   :  { %3005 = vpow2.f32 %v2248_v27 }
 0x85f   :  { %3007 = vtanh.f32 %v3729_v44 }
 0x867   :  { %v3004_v17 = vpop.eup %3003 }
 0x868   :  { %v1169_v46 = vmul.f32 %v3004_v17, %v3002_v16  ;;  %v3006_v60 = vpop.eup %3005 }
 0x869   :  { %v1179_v39 = vadd.f32 1.0, %v3006_v60  ;;  %v3008_v48 = vpop.eup %3007 }
 0x86a   :  { %1200 = vrot.lane.b32.xlu1 %v1169_v46, %s3226_s12 }
 0x86b   :  { %3009 = vrcp.f32 %v1179_v39 }
 0x875   :  { %v3010_v50 = vpop.eup %3009 }
 0x876   :  { %v3732_v59 = vmul.f32 %v3010_v50, %v3008_v48 }
 0x8dc   :  { %v1201_v5 = vpop.permute.xlu1 %1200 }
 0x8dd   :  { %v1203_v45 = vsel %vm346_vm2, %v1201_v5, %v3732_v59 }
 0x8de   :  { %1269 = vmatmul.mubr.f32.vlgmr.msra.gmra.mrb[8].mxu1 %v1203_v45  ;;  %1340 = vmatmul.mubr.f32.vlgmr.msra.gmra.mrb[14].mxu0 %v1203_v45 }
 0x8df   :  { %2648 = vmatpush1.bf16.msra.mxu1 %v3392_v53  ;;  %2680 = vmatpush1.bf16.msra.mxu0 %v3511_v24 }
 0x8e0   :  { %2650 = vmatprep.subr.bf16.mxu1 %v3395_v57  ;;  %2682 = vmatprep.subr.bf16.mxu0 %v3513_v25 }
 0x8e1   :  { %1468 = vmatprep.mubr.f32.mxu1 %v3227_v43  ;;  %1539 = vmatprep.mubr.f32.mxu0 %v3227_v43 }
 0x8e3   :  { %2652 = vmatpush1.bf16.msra.mxu1 %v3401_v0  ;;  %2684 = vmatpush1.bf16.msra.mxu0 %v3517_v32 }
 0x8e4   :  { %2654 = vmatprep.subr.bf16.mxu1 %v3404_v2  ;;  %2686 = vmatprep.subr.bf16.mxu0 %v3520_v33 }
 0x8e7   :  { %2656 = vmatpush1.bf16.msra.mxu1 %v3409_v10  ;;  %2688 = vmatpush1.bf16.msra.mxu0 %v3523_v40 }
 0x8e8   :  { %2658 = vmatprep.subr.bf16.mxu1 %v3413_v12  ;;  %2690 = vmatprep.subr.bf16.mxu0 %v3526_v41 }
 0x8eb   :  { %2660 = vmatpush1.bf16.msra.mxu1 %v3419_v20  ;;  %2692 = vmatpush1.bf16.msra.mxu0 %v3529_v51 }
 0x8ec   :  { %2662 = vmatprep.subr.bf16.mxu1 %v3422_v22  ;;  %2694 = vmatprep.subr.bf16.mxu0 %v3532_v54 }
 0x8ef   :  { %2664 = vmatpush1.bf16.msra.mxu1 %v3427_v28  ;;  %2696 = vmatpush1.bf16.msra.mxu0 %v3535_v63 }
 0x8f0   :  { %2666 = vmatprep.subr.bf16.mxu1 %v3431_v30  ;;  %2698 = vmatprep.subr.bf16.mxu0 %v3538_v1 }
 0x8f3   :  { %2668 = vmatpush1.bf16.msra.mxu1 %v3437_v36  ;;  %2700 = vmatpush1.bf16.msra.mxu0 %v3541_v11 }
 0x8f4   :  { %2670 = vmatprep.subr.bf16.mxu1 %v3440_v38  ;;  %2702 = vmatprep.subr.bf16.mxu0 %v3544_v14 }
 0x8f7   :  { %2672 = vmatpush1.bf16.msra.mxu1 %v3445_v47  ;;  %2704 = vmatpush1.bf16.msra.mxu0 %v3547_v21 }
 0x8f8   :  { %2674 = vmatprep.subr.bf16.mxu1 %v3449_v49  ;;  %2706 = vmatprep.subr.bf16.mxu0 %v3550_v23 }
 0x8fb   :  { %2676 = vmatpush1.bf16.msra.mxu1 %v3454_v52  ;;  %2708 = vmatpush1.bf16.msra.mxu0 %v3553_v29 }
 0x8fc   :  { %2710 = vmatprep.subr.bf16.mxu1 %v3380_v42  ;;  %2742 = vmatprep.subr.bf16.mxu0 %v3509_v18 }
 0x9b1   :  { %v1270_v58 = vpop.f32.mrb[8].mxu1  ;;  %v1341_v37 = vpop.f32.mrb[14].mxu0 }
 0x9b2   :  { %v2889_v56 = vadd.f32 %v1270_v58, %v3493_v62  ;;  %v1370_v55 = vadd.f32 %v1341_v37, %v3606_v13  ;;  %v1272_v61 = vpop.f32.mrb[9].mxu1  ;;  %v1343_v3 = vpop.f32.mrb[15].mxu0 }
 0x9b3   :  { %v2890_v26 = vadd.f32 %v1272_v61, %v3499_v6  ;;  %v1371_v7 = vadd.f32 %v1343_v3, %v3612_v19 }
 0x9b4   :  { %v2249_v8 = vmul.f32 -1.442695, %v2889_v56  ;;  %v2251_v9 = vmul.f32 -1.442695, %v1370_v55 }
 0x9b5   :  { %v2250_v5 = vmul.f32 -1.442695, %v2890_v26 }
 0x9b6   :  { %3011 = vpow2.f32 %v2249_v8 }
 0x9b7   :  { %3013 = vpow2.f32 %v2251_v9  ;;  %v2252_v9 = vmul.f32 -1.442695, %v1371_v7 }
 0x9b8   :  { %3015 = vtanh.f32 %v2890_v26 }
 0x9b9   :  { %3017 = vtanh.f32 %v1371_v7 }
 0x9c0   :  { %v3012_v16 = vpop.eup %3011 }
 0x9c1   :  { %v3014_v17 = vpop.eup %3013  ;;  %v1354_v46 = vadd.f32 1.0, %v3012_v16 }
 0x9c2   :  { %v1378_v27 = vadd.f32 1.0, %v3014_v17  ;;  %v3016_v31 = vpop.eup %3015 }
 0x9c3   :  { %3019 = vrcp.f32 %v1354_v46  ;;  %v3018_v35 = vpop.eup %3017 }
 0x9c4   :  { %3021 = vrcp.f32 %v1378_v27 }
 0x9c5   :  { %3023 = vpow2.f32 %v2250_v5 }
 0x9cd   :  { %v3020_v60 = vpop.eup %3019 }
 0x9ce   :  { %v3022_v39 = vpop.eup %3021  ;;  %v1362_v48 = vmul.f32 %v3020_v60, %v3016_v31  ;;  %v1361_v37 = vmul.f32 %v3020_v60, %v3724_v15 }
 0x9cf   :  { %v1386_v50 = vmul.f32 %v3022_v39, %v3018_v35  ;;  %v3024_v45 = vpop.eup %3023  ;;  %v1385_v26 = vmul.f32 %v3022_v39, %v3729_v44 }
 0x9d0   :  { %1364 = vrot.lane.b32.xlu0 %v1362_v48, %s3226_s12  ;;  %v1355_v58 = vadd.f32 1.0, %v3024_v45 }
 0x9d1   :  { %1388 = vrot.lane.b32.xlu1 %v1386_v50, %s3226_s12 }
 0x9d2   :  { %3025 = vrcp.f32 %v1355_v58 }
 0x9dc   :  { %v3026_v61 = vpop.eup %3025 }
 0xa42   :  { %v1365_v56 = vpop.permute.xlu0 %1364 }
 0xa43   :  { %v3777_v55 = vadd.f32 %v1365_v56, %v1361_v37  ;;  %v1389_v16 = vpop.permute.xlu1 %1388 }
 0xa44   :  { %v3782_v46 = vadd.f32 %v1389_v16, %v1385_v26 }
 0xa45   :  { %3027 = vtanh.f32 %v3777_v55 }
 0xa46   :  { %3029 = vpow2.f32 %v2252_v9 }
 0xa47   :  { %3031 = vtanh.f32 %v3782_v46 }
 0xa4f   :  { %v3028_v3 = vpop.eup %3027 }
 0xa50   :  { %v1369_v8 = vmul.f32 %v3028_v3, %v3026_v61  ;;  %v3030_v17 = vpop.eup %3029 }
 0xa51   :  { %v1379_v15 = vadd.f32 1.0, %v3030_v17  ;;  %v3032_v27 = vpop.eup %3031 }
 0xa52   :  { %1400 = vrot.lane.b32.xlu0 %v1369_v8, %s3226_s12 }
 0xa53   :  { %3033 = vrcp.f32 %v1379_v15 }
 0xa5d   :  { %v3034_v31 = vpop.eup %3033 }
 0xa5e   :  { %v3785_v35 = vmul.f32 %v3034_v31, %v3032_v27 }
 0xac4   :  { %v1401_v60 = vpop.permute.xlu0 %1400 }
 0xac5   :  { %v1403_v48 = vsel %vm346_vm2, %v1401_v60, %v3785_v35 }
 0xac6   :  { %1469 = vmatmul.mubr.f32.vlgmr.msra.gmra.mrb[10].mxu1 %v1403_v48  ;;  %1540 = vmatmul.mubr.f32.vlgmr.msra.gmra.mrb[16].mxu0 %v1403_v48 }
 0xac7   :  { %2712 = vmatpush1.bf16.msra.mxu1 %v3392_v53  ;;  %2744 = vmatpush1.bf16.msra.mxu0 %v3511_v24 }
 0xac8   :  { %2714 = vmatprep.subr.bf16.mxu1 %v3395_v57  ;;  %2746 = vmatprep.subr.bf16.mxu0 %v3513_v25 }
 0xac9   :  { %1668 = vmatprep.mubr.f32.mxu1 %v3227_v43  ;;  %1739 = vmatprep.mubr.f32.mxu0 %v3227_v43 }
 0xacb   :  { %2716 = vmatpush1.bf16.msra.mxu1 %v3401_v0  ;;  %2748 = vmatpush1.bf16.msra.mxu0 %v3517_v32 }
 0xacc   :  { %2718 = vmatprep.subr.bf16.mxu1 %v3404_v2  ;;  %2750 = vmatprep.subr.bf16.mxu0 %v3520_v33 }
 0xacf   :  { %2720 = vmatpush1.bf16.msra.mxu1 %v3409_v10  ;;  %2752 = vmatpush1.bf16.msra.mxu0 %v3523_v40 }
 0xad0   :  { %2722 = vmatprep.subr.bf16.mxu1 %v3413_v12  ;;  %2754 = vmatprep.subr.bf16.mxu0 %v3526_v41 }
 0xad3   :  { %2724 = vmatpush1.bf16.msra.mxu1 %v3419_v20  ;;  %2756 = vmatpush1.bf16.msra.mxu0 %v3529_v51 }
 0xad4   :  { %2726 = vmatprep.subr.bf16.mxu1 %v3422_v22  ;;  %2758 = vmatprep.subr.bf16.mxu0 %v3532_v54 }
 0xad7   :  { %2728 = vmatpush1.bf16.msra.mxu1 %v3427_v28  ;;  %2760 = vmatpush1.bf16.msra.mxu0 %v3535_v63 }
 0xad8   :  { %2730 = vmatprep.subr.bf16.mxu1 %v3431_v30  ;;  %2762 = vmatprep.subr.bf16.mxu0 %v3538_v1 }
 0xadb   :  { %2732 = vmatpush1.bf16.msra.mxu1 %v3437_v36  ;;  %2764 = vmatpush1.bf16.msra.mxu0 %v3541_v11 }
 0xadc   :  { %2734 = vmatprep.subr.bf16.mxu1 %v3440_v38  ;;  %2766 = vmatprep.subr.bf16.mxu0 %v3544_v14 }
 0xadf   :  { %2736 = vmatpush1.bf16.msra.mxu1 %v3445_v47  ;;  %2768 = vmatpush1.bf16.msra.mxu0 %v3547_v21 }
 0xae0   :  { %2738 = vmatprep.subr.bf16.mxu1 %v3449_v49  ;;  %2770 = vmatprep.subr.bf16.mxu0 %v3550_v23 }
 0xae3   :  { %2740 = vmatpush1.bf16.msra.mxu1 %v3454_v52  ;;  %2772 = vmatpush1.bf16.msra.mxu0 %v3553_v29 }
 0xae4   :  { %2774 = vmatprep.subr.bf16.mxu1 %v3380_v42  ;;  %2806 = vmatprep.subr.bf16.mxu0 %v3509_v18 }
 0xb99   :  { %v1470_v44 = vpop.f32.mrb[10].mxu1  ;;  %v1541_v7 = vpop.f32.mrb[16].mxu0 }
 0xb9a   :  { %v2891_v39 = vadd.f32 %v1470_v44, %v3493_v62  ;;  %v1570_v50 = vadd.f32 %v1541_v7, %v3606_v13  ;;  %v1472_v5 = vpop.f32.mrb[11].mxu1  ;;  %v1543_v45 = vpop.f32.mrb[17].mxu0 }
 0xb9b   :  { %v2892_v56 = vadd.f32 %v1472_v5, %v3499_v6  ;;  %v1571_v61 = vadd.f32 %v1543_v45, %v3612_v19 }
 0xb9c   :  { %v2253_v58 = vmul.f32 -1.442695, %v2891_v39  ;;  %v2255_v37 = vmul.f32 -1.442695, %v1570_v50 }
 0xb9d   :  { %v2254_v60 = vmul.f32 -1.442695, %v2892_v56 }
 0xb9e   :  { %3035 = vpow2.f32 %v2253_v58 }
 0xb9f   :  { %3037 = vpow2.f32 %v2255_v37  ;;  %v2256_v37 = vmul.f32 -1.442695, %v1571_v61 }
 0xba0   :  { %3039 = vtanh.f32 %v2892_v56 }
 0xba1   :  { %3041 = vtanh.f32 %v1571_v61 }
 0xba8   :  { %v3036_v3 = vpop.eup %3035 }
 0xba9   :  { %v3038_v42 = vpop.eup %3037  ;;  %v1554_v8 = vadd.f32 1.0, %v3036_v3 }
 0xbaa   :  { %v1578_v9 = vadd.f32 1.0, %v3038_v42  ;;  %v3040_v16 = vpop.eup %3039 }
 0xbab   :  { %3043 = vrcp.f32 %v1554_v8  ;;  %v3042_v26 = vpop.eup %3041 }
 0xbac   :  { %3045 = vrcp.f32 %v1578_v9 }
 0xbad   :  { %3047 = vpow2.f32 %v2254_v60 }
 0xbb5   :  { %v3044_v17 = vpop.eup %3043 }
 0xbb6   :  { %v3046_v15 = vpop.eup %3045  ;;  %v1562_v27 = vmul.f32 %v3044_v17, %v3040_v16  ;;  %v1561_v7 = vmul.f32 %v3044_v17, %v3777_v55 }
 0xbb7   :  { %v1586_v31 = vmul.f32 %v3046_v15, %v3042_v26  ;;  %v3048_v48 = vpop.eup %3047  ;;  %v1585_v56 = vmul.f32 %v3046_v15, %v3782_v46 }
 0xbb8   :  { %1564 = vrot.lane.b32.xlu1 %v1562_v27, %s3226_s12  ;;  %v1555_v44 = vadd.f32 1.0, %v3048_v48 }
 0xbb9   :  { %1588 = vrot.lane.b32.xlu0 %v1586_v31, %s3226_s12 }
 0xbba   :  { %3049 = vrcp.f32 %v1555_v44 }
 0xbc4   :  { %v3050_v5 = vpop.eup %3049 }
 0xc2a   :  { %v1565_v39 = vpop.permute.xlu1 %1564 }
 0xc2b   :  { %v3830_v50 = vadd.f32 %v1565_v39, %v1561_v7  ;;  %v1589_v3 = vpop.permute.xlu0 %1588 }
 0xc2c   :  { %v3835_v8 = vadd.f32 %v1589_v3, %v1585_v56 }
 0xc2d   :  { %3051 = vtanh.f32 %v3830_v50 }
 0xc2e   :  { %3053 = vpow2.f32 %v2256_v37 }
 0xc2f   :  { %3055 = vtanh.f32 %v3835_v8 }
 0xc37   :  { %v3052_v45 = vpop.eup %3051 }
 0xc38   :  { %v1569_v58 = vmul.f32 %v3052_v45, %v3050_v5  ;;  %v3054_v42 = vpop.eup %3053 }
 0xc39   :  { %v1579_v55 = vadd.f32 1.0, %v3054_v42  ;;  %v3056_v9 = vpop.eup %3055 }
 0xc3a   :  { %1600 = vrot.lane.b32.xlu1 %v1569_v58, %s3226_s12 }
 0xc3b   :  { %3057 = vrcp.f32 %v1579_v55 }
 0xc45   :  { %v3058_v16 = vpop.eup %3057 }
 0xc46   :  { %v3838_v26 = vmul.f32 %v3058_v16, %v3056_v9 }
 0xcac   :  { %v1601_v17 = vpop.permute.xlu1 %1600 }
 0xcad   :  { %v1603_v27 = vsel %vm346_vm2, %v1601_v17, %v3838_v26 }
 0xcae   :  { %1669 = vmatmul.mubr.f32.vlgmr.msra.gmra.mrb[12].mxu1 %v1603_v27  ;;  %1740 = vmatmul.mubr.f32.vlgmr.msra.gmra.mrb[18].mxu0 %v1603_v27 }
 0xcaf   :  { %2776 = vmatpush1.bf16.msra.mxu1 %v3392_v53  ;;  %2808 = vmatpush1.bf16.msra.mxu0 %v3511_v24 }
 0xcb0   :  { %2778 = vmatprep.subr.bf16.mxu1 %v3395_v57  ;;  %2810 = vmatprep.subr.bf16.mxu0 %v3513_v25 }
 0xcb1   :  { %1868 = vmatprep.mubr.f32.mxu1 %v3227_v43  ;;  %1939 = vmatprep.mubr.f32.mxu0 %v3227_v43 }
 0xcb3   :  { %2780 = vmatpush1.bf16.msra.mxu1 %v3401_v0  ;;  %2812 = vmatpush1.bf16.msra.mxu0 %v3517_v32 }
 0xcb4   :  { %2782 = vmatprep.subr.bf16.mxu1 %v3404_v2  ;;  %2814 = vmatprep.subr.bf16.mxu0 %v3520_v33 }
 0xcb7   :  { %2784 = vmatpush1.bf16.msra.mxu1 %v3409_v10  ;;  %2816 = vmatpush1.bf16.msra.mxu0 %v3523_v40 }
 0xcb8   :  { %2786 = vmatprep.subr.bf16.mxu1 %v3413_v12  ;;  %2818 = vmatprep.subr.bf16.mxu0 %v3526_v41 }
 0xcbb   :  { %2788 = vmatpush1.bf16.msra.mxu1 %v3419_v20  ;;  %2820 = vmatpush1.bf16.msra.mxu0 %v3529_v51 }
 0xcbc   :  { %2790 = vmatprep.subr.bf16.mxu1 %v3422_v22  ;;  %2822 = vmatprep.subr.bf16.mxu0 %v3532_v54 }
 0xcbf   :  { %2792 = vmatpush1.bf16.msra.mxu1 %v3427_v28  ;;  %2824 = vmatpush1.bf16.msra.mxu0 %v3535_v63 }
 0xcc0   :  { %2794 = vmatprep.subr.bf16.mxu1 %v3431_v30  ;;  %2826 = vmatprep.subr.bf16.mxu0 %v3538_v1 }
 0xcc3   :  { %2796 = vmatpush1.bf16.msra.mxu1 %v3437_v36  ;;  %2828 = vmatpush1.bf16.msra.mxu0 %v3541_v11 }
 0xcc4   :  { %2798 = vmatprep.subr.bf16.mxu1 %v3440_v38  ;;  %2830 = vmatprep.subr.bf16.mxu0 %v3544_v14 }
 0xcc7   :  { %2800 = vmatpush1.bf16.msra.mxu1 %v3445_v47  ;;  %2832 = vmatpush1.bf16.msra.mxu0 %v3547_v21 }
 0xcc8   :  { %2802 = vmatprep.subr.bf16.mxu1 %v3449_v49  ;;  %2834 = vmatprep.subr.bf16.mxu0 %v3550_v23 }
 0xccb   :  { %2804 = vmatpush1.bf16.msra.mxu1 %v3454_v52  ;;  %2836 = vmatpush1.bf16.msra.mxu0 %v3553_v29 }
 0xccc   :  { %2838 = vmatprep.subr.bf16.mxu0 %v3509_v18 }
 0xd81   :  { %v1670_v53 = vpop.f32.mrb[12].mxu1  ;;  %v1741_v57 = vpop.f32.mrb[18].mxu0 }
 0xd82   :  { %v2893_v0 = vadd.f32 %v1670_v53, %v3493_v62  ;;  %v1770_v2 = vadd.f32 %v1741_v57, %v3606_v13  ;;  %v1672_v10 = vpop.f32.mrb[13].mxu1  ;;  %v1743_v12 = vpop.f32.mrb[19].mxu0 }
 0xd83   :  { %v2894_v28 = vadd.f32 %v1672_v10, %v3499_v6  ;;  %v1771_v30 = vadd.f32 %v1743_v12, %v3612_v19 }
 0xd84   :  { %v2257_v20 = vmul.f32 -1.442695, %v2893_v0  ;;  %v2259_v22 = vmul.f32 -1.442695, %v1770_v2 }
 0xd85   :  { %v2258_v60 = vmul.f32 -1.442695, %v2894_v28  ;;  %v2260_v3 = vmul.f32 -1.442695, %v1771_v30 }
 0xd86   :  { %3059 = vpow2.f32 %v2257_v20 }
 0xd87   :  { %3061 = vpow2.f32 %v2259_v22 }
 0xd88   :  { %3063 = vtanh.f32 %v2894_v28 }
 0xd89   :  { %3065 = vtanh.f32 %v1771_v30 }
 0xd90   :  { %v3060_v36 = vpop.eup %3059 }
 0xd91   :  { %v3062_v38 = vpop.eup %3061  ;;  %v1754_v47 = vadd.f32 1.0, %v3060_v36 }
 0xd92   :  { %v1778_v49 = vadd.f32 1.0, %v3062_v38  ;;  %v3064_v52 = vpop.eup %3063 }
 0xd93   :  { %3067 = vrcp.f32 %v1754_v47  ;;  %v3066_v18 = vpop.eup %3065 }
 0xd94   :  { %3069 = vrcp.f32 %v1778_v49 }
 0xd95   :  { %3071 = vpow2.f32 %v2258_v60 }
 0xd9d   :  { %v3068_v46 = vpop.eup %3067 }
 0xd9e   :  { %v3070_v61 = vpop.eup %3069  ;;  %v1762_v15 = vmul.f32 %v3068_v46, %v3064_v52  ;;  %v1761_v7 = vmul.f32 %v3068_v46, %v3830_v50 }
 0xd9f   :  { %v1786_v31 = vmul.f32 %v3070_v61, %v3066_v18  ;;  %v3072_v48 = vpop.eup %3071  ;;  %v1785_v42 = vmul.f32 %v3070_v61, %v3835_v8 }
 0xda0   :  { %1764 = vrot.lane.b32.xlu0 %v1762_v15, %s3226_s12  ;;  %v1755_v44 = vadd.f32 1.0, %v3072_v48 }
 0xda1   :  { %1788 = vrot.lane.b32.xlu1 %v1786_v31, %s3226_s12 }
 0xda2   :  { %3073 = vrcp.f32 %v1755_v44 }
 0xdac   :  { %v3074_v45 = vpop.eup %3073 }
 0xe12   :  { %v1765_v39 = vpop.permute.xlu0 %1764 }
 0xe13   :  { %v3882_v5 = vadd.f32 %v1765_v39, %v1761_v7  ;;  %v1789_v56 = vpop.permute.xlu1 %1788 }
 0xe14   :  { %v3887_v9 = vadd.f32 %v1789_v56, %v1785_v42 }
 0xe15   :  { %3075 = vtanh.f32 %v3882_v5 }
 0xe16   :  { %3077 = vpow2.f32 %v2260_v3 }
 0xe17   :  { %3079 = vtanh.f32 %v3887_v9 }
 0xe1f   :  { %v3076_v58 = vpop.eup %3075 }
 0xe20   :  { %v1769_v37 = vmul.f32 %v3076_v58, %v3074_v45  ;;  %v3078_v55 = vpop.eup %3077 }
 0xe21   :  { %v1779_v50 = vadd.f32 1.0, %v3078_v55  ;;  %v3080_v16 = vpop.eup %3079 }
 0xe22   :  { %1800 = vrot.lane.b32.xlu0 %v1769_v37, %s3226_s12 }
 0xe23   :  { %3081 = vrcp.f32 %v1779_v50 }
 0xe2d   :  { %v3082_v17 = vpop.eup %3081 }
 0xe2e   :  { %v3890_v27 = vmul.f32 %v3082_v17, %v3080_v16  ;;  %v2105_v16 = vld [vmem:[%s3995_s9] sm:$0xff]  ;;  %v3228_v17 = vmov 0.0|0.0  }
 0xe94   :  { %v1801_v53 = vpop.permute.xlu0 %1800 }
 0xe95   :  { %v1803_v57 = vsel %vm346_vm2, %v1801_v53, %v3890_v27 }
 0xe96   :  { %1869 = vmatmul.mubr.f32.vlgmr.msra.gmra.mrb[14].mxu1 %v1803_v57  ;;  %1940 = vmatmul.mubr.f32.vlgmr.msra.gmra.mrb[20].mxu0 %v1803_v57  ;;  %v2108_v57 = vld [vmem:[%s3995_s9 + $0x18] sm:$0xff] }
 0xe97   :  { %2840 = vmatpush1.bf16.msra.mxu0 %v3511_v24  ;;  %2068 = vmatprep.mubr.f32.mxu0 %v3227_v43 }
 0xe98   :  { %2842 = vmatprep.subr.bf16.mxu0 %v3513_v25 }
 0xe9b   :  { %2844 = vmatpush1.bf16.msra.mxu0 %v3517_v32 }
 0xe9c   :  { %2846 = vmatprep.subr.bf16.mxu0 %v3520_v33 }
 0xe9f   :  { %2848 = vmatpush1.bf16.msra.mxu0 %v3523_v40 }
 0xea0   :  { %2850 = vmatprep.subr.bf16.mxu0 %v3526_v41 }
 0xea3   :  { %2852 = vmatpush1.bf16.msra.mxu0 %v3529_v51 }
 0xea4   :  { %2854 = vmatprep.subr.bf16.mxu0 %v3532_v54 }
 0xea7   :  { %2856 = vmatpush1.bf16.msra.mxu0 %v3535_v63 }
 0xea8   :  { %2858 = vmatprep.subr.bf16.mxu0 %v3538_v1 }
 0xeab   :  { %2860 = vmatpush1.bf16.msra.mxu0 %v3541_v11 }
 0xeac   :  { %2862 = vmatprep.subr.bf16.mxu0 %v3544_v14 }
 0xeaf   :  { %2864 = vmatpush1.bf16.msra.mxu0 %v3547_v21 }
 0xeb0   :  { %2866 = vmatprep.subr.bf16.mxu0 %v3550_v23 }
 0xeb3   :  { %2868 = vmatpush1.bf16.msra.mxu0 %v3553_v29 }
 0xeb4   :  { %2869 = vmatprep.subr.bf16.mxu0 %v3228_v17 }
 0xf69   :  { %v1870_v24 = vpop.f32.mrb[14].mxu1  ;;  %v1941_v25 = vpop.f32.mrb[20].mxu0 }
 0xf6a   :  { %v2895_v32 = vadd.f32 %v1870_v24, %v3493_v62  ;;  %v1970_v33 = vadd.f32 %v1941_v25, %v3606_v13  ;;  %v1872_v40 = vpop.f32.mrb[15].mxu1  ;;  %v1943_v41 = vpop.f32.mrb[21].mxu0 }
 0xf6b   :  { %v2896_v63 = vadd.f32 %v1872_v40, %v3499_v6  ;;  %v1971_v1 = vadd.f32 %v1943_v41, %v3612_v19 }
 0xf6c   :  { %v2261_v51 = vmul.f32 -1.442695, %v2895_v32  ;;  %v2263_v54 = vmul.f32 -1.442695, %v1970_v33 }
 0xf6d   :  { %v2262_v6 = vmul.f32 -1.442695, %v2896_v63  ;;  %v2264_v20 = vmul.f32 -1.442695, %v1971_v1 }
 0xf6e   :  { %3083 = vpow2.f32 %v2261_v51 }
 0xf6f   :  { %3085 = vpow2.f32 %v2263_v54 }
 0xf70   :  { %3087 = vtanh.f32 %v2896_v63 }
 0xf71   :  { %3089 = vtanh.f32 %v1971_v1  ;;  %v2112_v1 = vld [vmem:[%s3995_s9 + $0x38] sm:$0xff] }
 0xf78   :  { %v3084_v11 = vpop.eup %3083 }
 0xf79   :  { %v3086_v14 = vpop.eup %3085  ;;  %v1954_v21 = vadd.f32 1.0, %v3084_v11 }
 0xf7a   :  { %v1978_v23 = vadd.f32 1.0, %v3086_v14  ;;  %v3088_v62 = vpop.eup %3087 }
 0xf7b   :  { %3091 = vrcp.f32 %v1954_v21  ;;  %v3090_v29 = vpop.eup %3089 }
 0xf7c   :  { %3093 = vrcp.f32 %v1978_v23 }
 0xf7d   :  { %3095 = vpow2.f32 %v2262_v6 }
 0xf7e   :  { %3097 = vpow2.f32 %v2264_v20 }
 0xf85   :  { %v3092_v8 = vpop.eup %3091 }
 0xf86   :  { %v3094_v0 = vpop.eup %3093  ;;  %v1962_v2 = vmul.f32 %v3092_v8, %v3088_v62  ;;  %v1961_v28 = vmul.f32 %v3092_v8, %v3882_v5 }
 0xf87   :  { %v1986_v10 = vmul.f32 %v3094_v0, %v3090_v29  ;;  %v3096_v12 = vpop.eup %3095  ;;  %v1985_v49 = vmul.f32 %v3094_v0, %v3887_v9  ;;  %v2267_v0 = vld [vmem:[%s3996_s10] ss:$0 sm:$0xff] }
 0xf88   :  { %1964 = vrot.lane.b32.xlu1 %v1962_v2, %s3226_s12  ;;  %v1955_v22 = vadd.f32 1.0, %v3096_v12  ;;  %v3098_v47 = vpop.eup %3097 }
 0xf89   :  { %1988 = vrot.lane.b32.xlu0 %v1986_v10, %s3226_s12  ;;  %v1979_v15 = vadd.f32 1.0, %v3098_v47 }
 0xf8a   :  { %3099 = vrcp.f32 %v1955_v22 }
 0xf94   :  { %v3100_v52 = vpop.eup %3099 }
 0xffa   :  { %v1965_v30 = vpop.permute.xlu1 %1964 }
 0xffb   :  { %v1967_v36 = vadd.f32 %v1965_v30, %v1961_v28  ;;  %v1989_v38 = vpop.permute.xlu0 %1988 }
 0xffc   :  { %v1991_v46 = vadd.f32 %v1989_v38, %v1985_v49 }
 0xffd   :  { %3101 = vtanh.f32 %v1967_v36 }
 0xffe   :  { %3103 = vtanh.f32 %v1991_v46 }
 0xfff   :  { %3105 = vrcp.f32 %v1979_v15 }
0x1007   :  { %v3102_v18 = vpop.eup %3101 }
0x1008   :  { %v1969_v61 = vmul.f32 %v3102_v18, %v3100_v52  ;;  %v3104_v31 = vpop.eup %3103 }
0x1009   :  { %v3106_v60 = vpop.eup %3105 }
0x100a   :  { %2000 = vrot.lane.b32.xlu1 %v1969_v61, %s3226_s12  ;;  %v1993_v48 = vmul.f32 %v3106_v60, %v3104_v31 }
0x100e   :  { %794 = vrot.lane.b32.xlu1 %v3626_v34, %s3226_s12 }
0x1012   :  { %1195 = vrot.lane.b32.xlu1 %v3732_v59, %s3226_s12 }
0x1016   :  { %1595 = vrot.lane.b32.xlu1 %v3838_v26, %s3226_s12 }
0x101a   :  { %1995 = vrot.lane.b32.xlu1 %v1993_v48, %s3226_s12 }
0x107c   :  { %v2001_v44 = vpop.permute.xlu1 %2000 }
0x107d   :  { %v2003_v7 = vsel %vm346_vm2, %v2001_v44, %v1993_v48 }
0x107e   :  { %2069 = vmatmul.mubr.f32.vlgmr.msra.gmra.mrb[22].mxu0 %v2003_v7 }
0x107f   :  { %2330 = vmatprep.mubr.msk.f32.mxu0 %vm3229_vm4, %v3227_v43 }
0x1080   :  { %v795_v39 = vpop.permute.xlu1 %794 }
0x1081   :  { %798 = vst.msk [vmem:[#allocation2 - $0x1] sm:$0x2] %vm797_vm3, %v795_v39 }
0x1084   :  { %v1196_v34 = vpop.permute.xlu1 %1195 }
0x1085   :  { %1198 = vst.msk [vmem:[#allocation2 + $0x1] sm:$0x2] %vm797_vm3, %v1196_v34 }
0x1088   :  { %v1596_v59 = vpop.permute.xlu1 %1595 }
0x1089   :  { %1598 = vst.msk [vmem:[#allocation2 + $0x3] sm:$0x2] %vm797_vm3, %v1596_v59 }
0x108c   :  { %v1996_v5 = vpop.permute.xlu1 %1995 }
0x108d   :  { %1998 = vst.msk [vmem:[#allocation2 + $0x5] sm:$0x2] %vm797_vm3, %v1996_v5 }
0x1151   :  { %v2070_v26 = vpop.f32.mrb[22].mxu0 }
0x1152   :  { %v2075_v45 = vadd.f32 %v2070_v26, %v3606_v13  ;;  %v2072_v58 = vpop.f32.mrb[23].mxu0  ;;  %v2106_v13 = vld [vmem:[%s3995_s9 + $0x8] sm:$0xff] }
0x1153   :  { %v2076_v3 = vadd.f32 %v2072_v58, %v3612_v19  ;;  %v2107_v19 = vld [vmem:[%s3995_s9 + $0x10] sm:$0xff]  ;;  %v2870_v53 = vpack.c.bf16 %v2106_v13, %v2105_v16 }
0x1154   :  { %v2265_v37 = vmul.f32 -1.442695, %v2075_v45  ;;  %v2873_v24 = vpack.c.bf16 %v2108_v57, %v2107_v19 }
0x1155   :  { %2871 = vmatpush3.bf16.msra.mxu0 %v2870_v53  ;;  %v2266_v25 = vmul.f32 -1.442695, %v2076_v3 }
0x1156   :  { %3107 = vpow2.f32 %v2265_v37  ;;  %2872 = vmatprep.subr.bf16.mxu0 %v3228_v17 }
0x1157   :  { %3109 = vtanh.f32 %v2076_v3 }
0x1159   :  { %2874 = vmatpush3.bf16.msra.mxu0 %v2873_v24 }
0x115a   :  { %2875 = vmatprep.subr.bf16.mxu0 %v3228_v17 }
0x1160   :  { %v3108_v56 = vpop.eup %3107 }
0x1161   :  { %v2083_v42 = vadd.f32 1.0, %v3108_v56  ;;  %v3110_v55 = vpop.eup %3109 }
0x1163   :  { %3111 = vrcp.f32 %v2083_v42 }
0x1164   :  { %3113 = vpow2.f32 %v2266_v25 }
0x116d   :  { %v3112_v9 = vpop.eup %3111 }
0x116e   :  { %v2091_v50 = vmul.f32 %v3112_v9, %v3110_v55  ;;  %v3114_v32 = vpop.eup %3113  ;;  %v2090_v40 = vmul.f32 %v3112_v9, %v1991_v46 }
0x116f   :  { %v2084_v33 = vadd.f32 1.0, %v3114_v32 }
0x1170   :  { %2093 = vrot.lane.b32.xlu0 %v2091_v50, %s3226_s12 }
0x1171   :  { %3115 = vrcp.f32 %v2084_v33 }
0x1174   :  { %995 = vrot.lane.b32.xlu0 %v3679_v4, %s3226_s12  ;;  %v2109_v4 = vld [vmem:[%s3995_s9 + $0x20] sm:$0xff] }
0x1178   :  { %1395 = vrot.lane.b32.xlu0 %v3785_v35, %s3226_s12  ;;  %v2110_v35 = vld [vmem:[%s3995_s9 + $0x28] sm:$0xff] }
0x1179   :  { %v2876_v63 = vpack.c.bf16 %v2110_v35, %v2109_v4 }
0x117b   :  { %2877 = vmatpush3.bf16.msra.mxu0 %v2876_v63  ;;  %v3116_v21 = vpop.eup %3115 }
0x117c   :  { %1795 = vrot.lane.b32.xlu0 %v3890_v27, %s3226_s12  ;;  %v2111_v27 = vld [vmem:[%s3995_s9 + $0x30] sm:$0xff]  ;;  %2878 = vmatprep.subr.bf16.mxu0 %v3228_v17 }
0x117d   :  { %v2879_v11 = vpack.c.bf16 %v2112_v1, %v2111_v27 }
0x117f   :  { %2880 = vmatpush3.bf16.msra.mxu0 %v2879_v11 }
0x11e2   :  { %v2094_v41 = vpop.permute.xlu0 %2093 }
0x11e3   :  { %v2096_v51 = vadd.f32 %v2094_v41, %v2090_v40 }
0x11e5   :  { %3117 = vtanh.f32 %v2096_v51 }
0x11e6   :  { %v996_v54 = vpop.permute.xlu0 %995 }
0x11e7   :  { %998 = vst.msk [vmem:[#allocation2] sm:$0x2] %vm797_vm3, %v996_v54 }
0x11ea   :  { %v1396_v14 = vpop.permute.xlu0 %1395 }
0x11eb   :  { %1398 = vst.msk [vmem:[#allocation2 + $0x2] sm:$0x2] %vm797_vm3, %v1396_v14 }
0x11ee   :  { %v1796_v23 = vpop.permute.xlu0 %1795 }
0x11ef   :  { %v3118_v62 = vpop.eup %3117  ;;  %1798 = vst.msk [vmem:[#allocation2 + $0x4] sm:$0x2] %vm797_vm3, %v1796_v23 }
0x11f0   :  { %v2098_v29 = vmul.f32 %v3118_v62, %v3116_v21 }
0x11f2   :  { %2100 = vrot.lane.b32.xlu0 %v2098_v29, %s3226_s12  ;;  %s2206_s12 = sshll.u32 %s3230_s18, 4  ;;  %s2207_s12 = int_to_ptr.vmem [resolvable:$true] %s2206_s12 }
0x11f3   :  { %s3189_s23 = scalar_lea.vmem %s2207_s12, 128  ;;  %p3194_p11 = scmp.lt.s32.totalorder %s2207_s12, %s2207_s12 }
0x11f4   :  { %p3190_p10 = scmp.ne.s32.totalorder %s2207_s12, %s3189_s23  ;;  %p3195_p12 = scmp.lt.s32.totalorder %s3189_s23, %s3189_s23 }
0x11f6   :  { %p3196_p13 = por %p3195_p12, %p3194_p11 }
0x11f8   :  { %p3197_p0 = pnand %p3196_p13, %p3190_p10 }
0x1264   :  { %v2101_v8 = vpop.permute.xlu0 %2100 }
0x1265   :  { %2103 = vst.msk [vmem:[#allocation2 + $0x6] sm:$0x2] %vm797_vm3, %v2101_v8 }
0x126c   :  { %v2104_v43 = vld [vmem:[#allocation2] sm:$0xff] }
0x126d   :  { %2331 = vmatmul.mubr.msk.f32.vlgmr.msra.gmra.mrb[24].mxu0 %vm346_vm2, %v2104_v43 }
0x1340   :  { %v2189_v2 = vpop.f32.mrb[24].mxu0 }
0x1341   :  { %v2190_v10 = vadd.f32 %v2267_v0, %v2189_v2  ;;  %v2332_v6 = vpop.f32.mrb[25].mxu0 }
0x1343   :  { %v2269_v12 = vmul.f32 -1.442695, %v2190_v10 }
0x1345   :  { %3119 = vpow2.f32 %v2269_v12 }
0x134f   :  { %v3120_v20 = vpop.eup %3119 }
0x1350   :  { %v2196_v22 = vadd.f32 1.0, %v3120_v20 }
0x1352   :  { %3121 = vrcp.f32 %v2196_v22 }
0x135c   :  { %v3122_v28 = vpop.eup %3121 }
0x135d   :  { %2199 = vst [vmem:[#allocation9] sm:$0xff] %v3122_v28 }
0x135e   :  { %3200 = shalt.err (!%p3197_p0)
}
0x135f   :  { %s3201_s24 = scalar_lea.hbm %s3997_s11, 128 }
0x1360   :  { %p3202_p1 = scmp.ne.s32.totalorder %s3997_s11, %s3201_s24  ;;  %p3205_p2 = scmp.lt.u32.totalorder %s3201_s24, %s3997_s11 }
0x1362   :  { %p3207_p3 = pnand %p3205_p2, %p3202_p1 }
0x1364   :  { %3210 = shalt.err (!%p3207_p3)
}
0x1365   :  { %2209 = dma.vmem_to_hbm [thread:$0]  %s2207_s12, 128, %s3997_s11, [#allocation5]  }
0x1366   :  { %3215 = dma.done.wait [#allocation5], 128  }
0x1367   :  { %3216 = vsyncadd [#allocation5], 4294967168 }
0x1368   :  { %2213 = vsyncpa [#allocation4], 1 }
0x1369   :  { %2214 = vsyncpa [#allocation7], 1 }
0x136a   :  { %2215 = vsyncpa [#allocation5], 1 }

</bundles_post_ra>
